<compile_context>
chip_gen: v7x
topology: tpu7x:2x2x1
jax: 0.10.0
libtpu: 0.0.40
codegen_flags: <defaults>
</compile_context>

<pallas_src>
import functools

import jax
import jax.numpy as jnp
from jax.experimental import pallas as pl
from jax.experimental.pallas import tpu as pltpu

ROW_TILE = 1024           # row tile when flattened N*H*W exceeds this
NEG = jnp.float32(-1e30)


# ----------------------------------------------------------------------------
# helpers (glue)
# ----------------------------------------------------------------------------
def _round_up(x, m):
    return ((x + m - 1) // m) * m


def _row_blocking(m):
    """Pick (row_tile, padded_rows): single block when small, 1024-row tiles otherwise."""
    if m <= ROW_TILE:
        tile = _round_up(m, 8)
        return tile, tile
    return ROW_TILE, _round_up(m, ROW_TILE)


def _pad_rows(x, mp, fill=0.0):
    m = x.shape[0]
    if mp != m:
        x = jnp.pad(x, [(0, mp - m)] + [(0, 0)] * (x.ndim - 1), constant_values=fill)
    return x


def _im2col(x, kh, kw, stride, pad):
    """x: (N,H,W,C) f32 -> bf16 patches (N*Ho*Wo, kh*kw*C), plus output spatial dims."""
    n, h, w, c = x.shape
    x = x.astype(jnp.bfloat16)        # halves HBM traffic for the (dominant) patch tensor
    xp = jnp.pad(x, ((0, 0), (pad, pad), (pad, pad), (0, 0)))
    ho = (h + 2 * pad - kh) // stride + 1
    wo = (w + 2 * pad - kw) // stride + 1
    cols = [xp[:, i:i + stride * ho:stride, j:j + stride * wo:stride, :]
            for i in range(kh) for j in range(kw)]
    patches = jnp.concatenate(cols, axis=-1)          # (N,Ho,Wo,kh*kw*C)
    return patches.reshape(n * ho * wo, kh * kw * c), (n, ho, wo)


# ----------------------------------------------------------------------------
# Pallas kernels
# ----------------------------------------------------------------------------
def _mm_bias_kernel(x_ref, w_ref, b_ref, o_ref, *, relu):
    # (TM,K)bf16 @ (K,Cout)bf16 on the MXU, f32 accumulate + fused bias (+ReLU).
    acc = jnp.dot(x_ref[...], w_ref[...], preferred_element_type=jnp.float32)
    y = acc + b_ref[...]
    if relu:
        y = jnp.maximum(y, 0.0)
    o_ref[...] = y.astype(o_ref.dtype)


def _mm_bias_res_kernel(x_ref, w_ref, b_ref, r_ref, o_ref, *, relu):
    # Same as above plus a fused residual / FPN top-down add (f32).
    acc = jnp.dot(x_ref[...], w_ref[...], preferred_element_type=jnp.float32)
    y = acc + b_ref[...] + r_ref[...]
    if relu:
        y = jnp.maximum(y, 0.0)
    o_ref[...] = y.astype(o_ref.dtype)


def _maxpool_kernel(x_ref, o_ref):
    # reduce max over the leading (kernel-window) axis
    o_ref[...] = jnp.max(x_ref[...], axis=0)


# ----------------------------------------------------------------------------
# Pallas wrappers
# ----------------------------------------------------------------------------
def matmul_bias(x2d, w2d, bias, relu, residual=None):
    """(M,K) @ (K,Cout) with fused bias (+ residual) (+ ReLU).  bf16 MXU / f32 epilogue."""
    m, k = x2d.shape
    cout = w2d.shape[1]
    xb = x2d.astype(jnp.bfloat16)
    wb = w2d.astype(jnp.bfloat16)
    if k % 16:                          # keep bf16 sublane packing aligned (stem K=147)
        kp = _round_up(k, 16)
        xb = jnp.pad(xb, ((0, 0), (0, kp - k)))
        wb = jnp.pad(wb, ((0, kp - k), (0, 0)))
        k = kp
    tile, mp = _row_blocking(m)
    xb = _pad_rows(xb, mp)
    b2 = bias.reshape(1, cout).astype(jnp.float32)

    in_specs = [pl.BlockSpec((tile, k), lambda i: (i, 0)),
                pl.BlockSpec((k, cout), lambda i: (0, 0)),
                pl.BlockSpec((1, cout), lambda i: (0, 0))]
    args = [xb, wb, b2]
    if residual is None:
        kern = functools.partial(_mm_bias_kernel, relu=relu)
    else:
        kern = functools.partial(_mm_bias_res_kernel, relu=relu)
        in_specs.append(pl.BlockSpec((tile, cout), lambda i: (i, 0)))
        args.append(_pad_rows(residual.astype(jnp.float32), mp))

    out = pl.pallas_call(
        kern,
        out_shape=jax.ShapeDtypeStruct((mp, cout), jnp.float32),
        grid=(mp // tile,),
        in_specs=in_specs,
        out_specs=pl.BlockSpec((tile, cout), lambda i: (i, 0)),
        compiler_params=pltpu.CompilerParams(dimension_semantics=("parallel",)),
    )(*args)
    return out if mp == m else out[:m]


def conv2d_bn_act(x, w, scale, bias, stride, pad, relu, residual=None):
    """NHWC conv; frozen-BN scale folded into w; bias/residual/ReLU fused in the kernel."""
    kh, kw, cin, cout = w.shape
    wf = (w * scale.reshape(1, 1, 1, cout)).reshape(kh * kw * cin, cout)   # exact fold
    patches, (n, ho, wo) = _im2col(x, kh, kw, stride, pad)
    res2d = None if residual is None else residual.reshape(n * ho * wo, cout)
    y = matmul_bias(patches, wf, bias, relu, residual=res2d)
    return y.reshape(n, ho, wo, cout)


def maxpool2d(x, k=3, stride=2, pad=1):
    # TODO(synk): still reads k*k shifted views (9x pooled bytes); a single-pass
    # halo-read kernel needs strided in-kernel slicing which is kept out for robustness.
    n, h, w, c = x.shape
    xp = jnp.pad(x, ((0, 0), (pad, pad), (pad, pad), (0, 0)), constant_values=NEG)
    ho = (h + 2 * pad - k) // stride + 1
    wo = (w + 2 * pad - k) // stride + 1
    views = [xp[:, i:i + stride * ho:stride, j:j + stride * wo:stride, :]
             for i in range(k) for j in range(k)]
    stack = jnp.stack(views, 0).reshape(k * k, n * ho * wo, c)
    m = n * ho * wo
    tile, mp = _row_blocking(m)
    if mp != m:
        stack = jnp.pad(stack, ((0, 0), (0, mp - m), (0, 0)), constant_values=NEG)
    out = pl.pallas_call(
        _maxpool_kernel,
        out_shape=jax.ShapeDtypeStruct((mp, c), jnp.float32),
        grid=(mp // tile,),
        in_specs=[pl.BlockSpec((k * k, tile, c), lambda i: (0, i, 0))],
        out_specs=pl.BlockSpec((tile, c), lambda i: (i, 0)),
        compiler_params=pltpu.CompilerParams(dimension_semantics=("parallel",)),
    )(stack)
    out = out if mp == m else out[:m]
    return out.reshape(n, ho, wo, c)


def upsample_nearest2x(x):
    return jnp.repeat(jnp.repeat(x, 2, axis=1), 2, axis=2)


# ----------------------------------------------------------------------------
# deterministic parameter construction (synthetic; no checkpoint load)
# ----------------------------------------------------------------------------
STEM_C, C2, C3, C4, C5 = 16, 16, 32, 64, 128   # scaled-down ResNet50 widths
FPN_C = 32                                      # scaled-down FPN channels (real: 256)
NUM_ANCHORS = 3
RPN_PAD = 128                                   # lane-dense width for RPN head outputs


def _conv_w(key, kh, kw, cin, cout):
    fan = kh * kw * cin
    return (jax.random.normal(key, (kh, kw, cin, cout), jnp.float32)
            / jnp.sqrt(jnp.float32(fan)))


def _frozen_bn(key, c):
    k1, k2, k3, k4 = jax.random.split(key, 4)
    gamma = jax.random.uniform(k1, (c,), minval=0.5, maxval=1.5)
    beta = 0.1 * jax.random.normal(k2, (c,))
    mean = 0.1 * jax.random.normal(k3, (c,))
    var = jax.random.uniform(k4, (c,), minval=0.5, maxval=1.5)
    scale = gamma / jnp.sqrt(var + 1e-5)           # FrozenBatchNorm2d fold
    bias = beta - mean * scale                     # computed BEFORE folding scale into W
    return scale.astype(jnp.float32), bias.astype(jnp.float32)


def _bias(key, c):
    return 0.01 * jax.random.normal(key, (c,), jnp.float32)


def init_params(key):
    keys = iter(jax.random.split(key, 64))
    p = {}
    # ResNet stem
    p["stem_w"] = _conv_w(next(keys), 7, 7, 3, STEM_C)
    p["stem_bn"] = _frozen_bn(next(keys), STEM_C)
    # TODO(synk): full ResNet50 bottleneck stacks (3/4/6/3 blocks) reduced to one conv per stage
    p["res2_w"] = _conv_w(next(keys), 3, 3, STEM_C, C2)
    p["res2_bn"] = _frozen_bn(next(keys), C2)
    p["res3_w"] = _conv_w(next(keys), 3, 3, C2, C3)
    p["res3_bn"] = _frozen_bn(next(keys), C3)
    p["res4_w"] = _conv_w(next(keys), 3, 3, C3, C4)
    p["res4_bn"] = _frozen_bn(next(keys), C4)
    p["res5_w"] = _conv_w(next(keys), 3, 3, C4, C5)
    p["res5_bn"] = _frozen_bn(next(keys), C5)
    # FPN
    ones = lambda c: jnp.ones((c,), jnp.float32)
    for name, cin in (("lat2", C2), ("lat3", C3), ("lat4", C4), ("lat5", C5)):
        p[name + "_w"] = _conv_w(next(keys), 1, 1, cin, FPN_C)
        p[name + "_b"] = (ones(FPN_C), _bias(next(keys), FPN_C))
    for name in ("smooth2", "smooth3", "smooth4", "smooth5"):
        p[name + "_w"] = _conv_w(next(keys), 3, 3, FPN_C, FPN_C)
        p[name + "_b"] = (ones(FPN_C), _bias(next(keys), FPN_C))
    # RPN head
    p["rpn_conv_w"] = _conv_w(next(keys), 3, 3, FPN_C, FPN_C)
    p["rpn_conv_b"] = (ones(FPN_C), _bias(next(keys), FPN_C))
    p["rpn_cls_w"] = _conv_w(next(keys), 1, 1, FPN_C, NUM_ANCHORS)
    p["rpn_cls_b"] = (ones(NUM_ANCHORS), _bias(next(keys), NUM_ANCHORS))
    p["rpn_box_w"] = _conv_w(next(keys), 1, 1, FPN_C, 4 * NUM_ANCHORS)
    p["rpn_box_b"] = (ones(4 * NUM_ANCHORS), _bias(next(keys), 4 * NUM_ANCHORS))
    return p


# ----------------------------------------------------------------------------
# forward pass (mirrors Model.forward eval path: target=None -> (outputs, {}))
# ----------------------------------------------------------------------------
def model_forward(params, image_nchw, target=None):
    # TODO(synk): GeneralizedRCNNTransform (resize + ImageNet mean/std normalize) omitted.
    x = jnp.transpose(image_nchw.astype(jnp.float32), (0, 2, 3, 1))  # NCHW -> NHWC

    # --- backbone (ResNet, FrozenBatchNorm folded into conv weights) ---
    s, b = params["stem_bn"]
    x = conv2d_bn_act(x, params["stem_w"], s, b, stride=2, pad=3, relu=True)
    x = maxpool2d(x, k=3, stride=2, pad=1)

    s, b = params["res2_bn"]
    # residual block: relu(conv(x) + bn_bias + x) — add + ReLU fused in the matmul epilogue
    c2 = conv2d_bn_act(x, params["res2_w"], s, b, 1, 1, relu=True, residual=x)
    s, b = params["res3_bn"]
    c3 = conv2d_bn_act(c2, params["res3_w"], s, b, 2, 1, relu=True)
    s, b = params["res4_bn"]
    c4 = conv2d_bn_act(c3, params["res4_w"], s, b, 2, 1, relu=True)
    s, b = params["res5_bn"]
    c5 = conv2d_bn_act(c4, params["res5_w"], s, b, 2, 1, relu=True)

    # --- FPN (top-down adds fused into the lateral 1x1 conv epilogue) ---
    def lat(name, feat, residual=None):
        s, b = params[name + "_b"]
        return conv2d_bn_act(feat, params[name + "_w"], s, b, 1, 0,
                             relu=False, residual=residual)

    p5 = lat("lat5", c5)
    p4 = lat("lat4", c4, residual=upsample_nearest2x(p5))
    p3 = lat("lat3", c3, residual=upsample_nearest2x(p4))
    p2 = lat("lat2", c2, residual=upsample_nearest2x(p3))

    def smooth(name, feat):
        s, b = params[name + "_b"]
        return conv2d_bn_act(feat, params[name + "_w"], s, b, 1, 1, relu=False)

    pyramid = {"p2": smooth("smooth2", p2), "p3": smooth("smooth3", p3),
               "p4": smooth("smooth4", p4), "p5": smooth("smooth5", p5)}

    # --- RPN head: batch all 4 levels (shared weights) into 2 pallas_calls total ---
    levels = ("p2", "p3", "p4", "p5")
    patch_list, lvl_shapes, lvl_rows = [], [], []
    for lvl in levels:
        pch, shp = _im2col(pyramid[lvl], 3, 3, 1, 1)
        patch_list.append(pch)
        lvl_shapes.append(shp)
        lvl_rows.append(pch.shape[0])
    patches_all = jnp.concatenate(patch_list, axis=0)            # (sum_m, 9*FPN_C)

    # 3x3 shared conv, output zero-padded to 128 channels (lane-dense stores)
    s, b = params["rpn_conv_b"]
    w_conv = (params["rpn_conv_w"] * s.reshape(1, 1, 1, -1)).reshape(-1, FPN_C)
    w_conv = jnp.pad(w_conv, ((0, 0), (0, RPN_PAD - FPN_C)))
    b_conv = jnp.pad(b, ((0, RPN_PAD - FPN_C),))
    t_all = matmul_bias(patches_all, w_conv, b_conv, relu=True)  # (sum_m, 128)

    # fused cls + box 1x1 convs, zero-padded to a lane-dense 128-wide output
    sc, bc = params["rpn_cls_b"]
    sb, bb = params["rpn_box_b"]
    ncls, nbox = NUM_ANCHORS, 4 * NUM_ANCHORS
    w_cls = params["rpn_cls_w"].reshape(FPN_C, ncls) * sc.reshape(1, -1)
    w_box = params["rpn_box_w"].reshape(FPN_C, nbox) * sb.reshape(1, -1)
    w_head = jnp.concatenate([w_cls, w_box], axis=1)             # (FPN_C, 15)
    w_head = jnp.pad(w_head, ((0, RPN_PAD - FPN_C), (0, RPN_PAD - ncls - nbox)))
    b_head = jnp.pad(jnp.concatenate([bc, bb], axis=0), ((0, RPN_PAD - ncls - nbox),))
    head_all = matmul_bias(t_all, w_head, b_head, relu=False)    # (sum_m, 128)

    rpn_logits, rpn_deltas = {}, {}
    off = 0
    for lvl, (n, ho, wo), m in zip(levels, lvl_shapes, lvl_rows):
        blk = head_all[off:off + m]
        rpn_logits[lvl] = blk[:, :ncls].reshape(n, ho, wo, ncls)
        rpn_deltas[lvl] = blk[:, ncls:ncls + nbox].reshape(n, ho, wo, nbox)
        off += m

    # TODO(synk): proposal decoding, NMS, RoIAlign, box/mask ROI heads not translatable;
    # returning per-image FPN features + RPN outputs as the "detections".
    n_img = image_nchw.shape[0]
    outputs = []
    for i in range(n_img):
        outputs.append({
            "fpn_features": {k: v[i] for k, v in pyramid.items()},
            "rpn_objectness": {k: v[i] for k, v in rpn_logits.items()},
            "rpn_box_deltas": {k: v[i] for k, v in rpn_deltas.items()},
        })
    losses = {}
    if target is not None:
        # TODO(synk): training losses (RPN/ROI losses) not implemented.
        pass
    return outputs, losses


# ----------------------------------------------------------------------------
if __name__ == "__main__":
    key = jax.random.PRNGKey(0)
    k_img, k_par = jax.random.split(key)
    image = jax.random.uniform(k_img, (2, 3, 64, 64), jnp.float32)  # NCHW, [0,1]
    params = init_params(k_par)

    outputs, losses = model_forward(params, image, target=None)
    jax.block_until_ready(outputs[0]["rpn_objectness"]["p2"])
    jax.block_until_ready(outputs[1]["rpn_box_deltas"]["p5"])

    # sanity: expected shapes (64 -> stem/2 -> pool/2 => p2 is 16x16)
    assert outputs[0]["fpn_features"]["p2"].shape == (16, 16, FPN_C)
    assert outputs[0]["rpn_objectness"]["p5"].shape == (2, 2, NUM_ANCHORS)
    assert outputs[0]["rpn_box_deltas"]["p3"].shape == (8, 8, 4 * NUM_ANCHORS)
    print("KERNEL_OK")
</pallas_src>

<mosaic_0001>
module attributes {stable_mosaic.version = 11 : i64} {
  func.func @_mm_bias_kernel(%arg0: i32, %arg1: memref<1024x160xbf16, #tpu.memory_space<vmem>>, %arg2: memref<160x16xbf16, #tpu.memory_space<vmem>>, %arg3: memref<1x16xf32, #tpu.memory_space<vmem>>, %arg4: memref<1024x16xf32, #tpu.memory_space<vmem>>) attributes {dimension_semantics = [#tpu.dimension_semantics<parallel>], iteration_bounds = array<i64: 2>, scalar_prefetch = 0 : i64, scratch_operands = 0 : i64, tpu.core_type = #tpu.core_type<tc>, window_params = [{transform_indices = @transform_0, window_bounds = array<i64: 1024, 160>}, {pipeline_mode = #tpu.pipeline_mode<synchronous>, transform_indices = @transform_1, window_bounds = array<i64: 160, 16>}, {pipeline_mode = #tpu.pipeline_mode<synchronous>, transform_indices = @transform_2, window_bounds = array<i64: 1, 16>}, {transform_indices = @transform_3, window_bounds = array<i64: 1024, 16>}]} {
    %c0 = arith.constant 0 : index
    %c0_0 = arith.constant 0 : index
    %0 = vector.load %arg1[%c0, %c0_0] : memref<1024x160xbf16, #tpu.memory_space<vmem>>, vector<1024x160xbf16>
    %c0_1 = arith.constant 0 : index
    %c0_2 = arith.constant 0 : index
    %1 = vector.load %arg2[%c0_1, %c0_2] : memref<160x16xbf16, #tpu.memory_space<vmem>>, vector<160x16xbf16>
    %cst = arith.constant dense<0.000000e+00> : vector<1024x16xf32>
    %2 = tpu.matmul %0, %1, %cst {dimension_numbers = #tpu.dot_dimension_numbers<[1], [0], [0], [1], [0, 0, 1, 1], [], []>} : vector<1024x160xbf16>, vector<160x16xbf16>, vector<1024x16xf32> -> vector<1024x16xf32>
    %c0_3 = arith.constant 0 : index
    %c0_4 = arith.constant 0 : index
    %3 = vector.load %arg3[%c0_3, %c0_4] : memref<1x16xf32, #tpu.memory_space<vmem>>, vector<1x16xf32>
    %4 = vector.broadcast %3 : vector<1x16xf32> to vector<1024x16xf32>
    %5 = arith.addf %2, %4 : vector<1024x16xf32>
    %cst_5 = arith.constant 0.000000e+00 : f32
    %6 = vector.broadcast %cst_5 : f32 to vector<1024x16xf32>
    %7 = arith.maximumf %5, %6 : vector<1024x16xf32>
    %c0_6 = arith.constant 0 : index
    %c0_7 = arith.constant 0 : index
    %8 = vector.load %arg4[%c0_6, %c0_7] : memref<1024x16xf32, #tpu.memory_space<vmem>>, vector<1024x16xf32>
    tpu.vector_store %arg4[%c0_6, %c0_7], %7 {strides = array<i32>} : memref<1024x16xf32, #tpu.memory_space<vmem>>, vector<1024x16xf32>,
    return
  }
  func.func @transform_0(%arg0: i32) -> (i32, i32) {
    %c0_i32 = arith.constant 0 : i32
    %c0_i32_0 = arith.constant 0 : i32
    return %arg0, %c0_i32 : i32, i32
  }
  func.func @transform_1(%arg0: i32) -> (i32, i32) {
    %c0_i32 = arith.constant 0 : i32
    %c0_i32_0 = arith.constant 0 : i32
    %c0_i32_1 = arith.constant 0 : i32
    return %c0_i32, %c0_i32_0 : i32, i32
  }
  func.func @transform_2(%arg0: i32) -> (i32, i32) {
    %c0_i32 = arith.constant 0 : i32
    %c0_i32_0 = arith.constant 0 : i32
    %c0_i32_1 = arith.constant 0 : i32
    return %c0_i32, %c0_i32_0 : i32, i32
  }
  func.func @transform_3(%arg0: i32) -> (i32, i32) {
    %c0_i32 = arith.constant 0 : i32
    %c0_i32_0 = arith.constant 0 : i32
    return %arg0, %c0_i32 : i32, i32
  }
}

</mosaic_0001>

<bundles_post_ra>
// kernel: tpu_custom_call.1
= control target key start
LH: loop header
LB: loop body
LE: loop exit
PB: predicated region body
PF: predicated region fallthrough
CT: control target
= control target key end

     0   :  { %s2497_s12 = smov 0   ;;  %s3141_s0 = inlined_call_operand.vmem [shape: bf16[2048,160], index: 0, kind: input, shape index: {}]   ;;  %s3142_s1 = inlined_call_operand.vmem [shape: bf16[160,16], index: 1, kind: input, shape index: {}]   ;;  %s3143_s2 = inlined_call_operand.vmem [shape: f32[1,16], index: 2, kind: input, shape index: {}]   ;;  %s3144_s3 = inlined_call_operand.vmem [shape: f32[2048,16], index: 3, kind: output, shape index: {}]  }
   0x1 LB: > { %s2020_s13 = sadd.s32 4294967295, %s2474_s12   ;;  %p2024_p0 = scmp.ge.s32.totalorder %s2474_s12, 1  ;;  %s2474_s12 = sphi %s2497_s12, %s13_s12  }
   0x2   : > { %p139_p1 = scmp.lt.s32.totalorder %s2474_s12, 3 }
   0x4   : > { %p140_p2 = pnand %p2024_p0, %p139_p1 }
   0x5   : > { %v2265_v0 = vld [vmem:[%s3142_s1] sm:$0xff] (!%p140_p2)   ;;  %v2476_v1 = vmov (!%p140_p2), 0   ;;  %s2025_s16 = sshll.u32 (!%p140_p2), %s2020_s13, 7  ;;  %v2266_v2 = vld [vmem:[%s3142_s1 + $0x8] sm:$0xff] (!%p140_p2)   ;;  %v2267_v3 = vld [vmem:[%s3142_s1 + $0x10] sm:$0xff] (!%p140_p2)   ;;  %vm969_vm0 = vcmask (!%p140_p2), 261120  }
   0x6   : > { %143 = sbr.rel (%p140_p2) target bundleno = 513 (0x201), region = 32  ;;  %1162 = vmatprep.subr.bf16.mxu0 (!%p140_p2), %v2476_v1  ;;  %2236 = vmatprep.subr.bf16.mxu1 (!%p140_p2), %v2476_v1  ;;  %p165_p3 = scmp.lt.s32.totalorder (!%p140_p2), %s2025_s16, 255  ;;  %v2268_v4 = vld [vmem:[%s3142_s1 + $0x18] sm:$0xff] (!%p140_p2)   ;;  %v2269_v7 = vld [vmem:[%s3142_s1 + $0x20] sm:$0xff] (!%p140_p2)   ;;  %v2270_v8 = vld [vmem:[%s3142_s1 + $0x28] sm:$0xff] (!%p140_p2)   ;;  %vm1835_vm1 = vcmask (!%p140_p2), 130048  }
   0x7   : > { %1163 = vmatpush1.bf16.msra.mxu0 (!%p140_p2), %v2265_v0  ;;  %2246 = vmatpush1.bf16.msra.mxu1 (!%p140_p2), %v2265_v0  ;;  %v2271_v9 = vld [vmem:[%s3142_s1 + $0x30] sm:$0xff] (!%p140_p2)   ;;  %v2272_v10 = vld [vmem:[%s3142_s1 + $0x38] sm:$0xff] (!%p140_p2)   ;;  %v2273_v11 = vld [vmem:[%s3142_s1 + $0x40] sm:$0xff] (!%p140_p2)  }
   0x8   : > { %1164 = vmatprep.subr.bf16.mxu0 (!%p140_p2), %v2476_v1  ;;  %2237 = vmatprep.subr.bf16.mxu1 (!%p140_p2), %v2476_v1  ;;  %v2274_v12 = vld [vmem:[%s3142_s1 + $0x48] sm:$0xff] (!%p140_p2)  }
   0xb   : > { %1165 = vmatpush1.bf16.msra.mxu0 (!%p140_p2), %v2266_v2  ;;  %2247 = vmatpush1.bf16.msra.mxu1 (!%p140_p2), %v2266_v2 }
   0xc   : > { %1166 = vmatprep.subr.bf16.mxu0 (!%p140_p2), %v2476_v1  ;;  %2238 = vmatprep.subr.bf16.mxu1 (!%p140_p2), %v2476_v1 }
   0xd   : > { %s3146_s16 = smov (!%p165_p3, %s2025_s16), 255 }
   0xe   : > { %s2235_s21 = sshll.u32 %s3146_s16, 3 }
   0xf   : > { %s2522_s24 = scalar_lea.vmem %s3141_s0, %s2235_s21  ;;  %1167 = vmatpush1.bf16.msra.mxu0 %v2267_v3  ;;  %2248 = vmatpush1.bf16.msra.mxu1 %v2267_v3  ;;  %s2725_s18 = scalar_lea.vmem %s3144_s3, %s2235_s21 }
  0x10   : > { %1168 = vmatprep.subr.bf16.mxu0 %v2476_v1  ;;  %2239 = vmatprep.subr.bf16.mxu1 %v2476_v1  ;;  %v2277_v5 = vld [vmem:[%s2522_s24 + $0x4] ss:$8 sps:$4 sm:$0xff]   ;;  %v2275_v13 = vld [vmem:[%s2522_s24] ss:$8 sps:$4 sm:$0xff]   ;;  %v2281_v15 = vld [vmem:[%s2522_s24 + $0x14] ss:$8 sps:$4 sm:$0xff]  }
  0x11   : > { %v2280_v6 = vld [vmem:[%s2522_s24 + $0x204] ss:$8 sps:$4 sm:$0xff]   ;;  %2169 = vmatprep.mubr.msk.bf16.mxu0 %vm969_vm0, %v2277_v5  ;;  %v2278_v14 = vld [vmem:[%s2522_s24 + $0x200] ss:$8 sps:$4 sm:$0xff]   ;;  %v2283_v16 = vld [vmem:[%s2522_s24 + $0x214] ss:$8 sps:$4 sm:$0xff]  }
  0x12   : > { %2201 = vmatprep.mubr.msk.bf16.mxu1 %vm969_vm0, %v2280_v6  ;;  %v2285_v17 = vld [vmem:[%s2522_s24 + $0x10] ss:$8 sps:$4 sm:$0xff]   ;;  %v2287_v19 = vld [vmem:[%s2522_s24 + $0x24] ss:$8 sps:$4 sm:$0xff]   ;;  %v2291_v21 = vld [vmem:[%s2522_s24 + $0x20] ss:$8 sps:$4 sm:$0xff]  }
  0x13   : > { %1169 = vmatpush1.bf16.msra.mxu0 %v2268_v4  ;;  %2249 = vmatpush1.bf16.msra.mxu1 %v2268_v4  ;;  %v2286_v18 = vld [vmem:[%s2522_s24 + $0x210] ss:$8 sps:$4 sm:$0xff]   ;;  %v2289_v20 = vld [vmem:[%s2522_s24 + $0x224] ss:$8 sps:$4 sm:$0xff]   ;;  %v2292_v22 = vld [vmem:[%s2522_s24 + $0x220] ss:$8 sps:$4 sm:$0xff]  }
  0x14   : > { %1170 = vmatprep.subr.bf16.mxu0 %v2476_v1  ;;  %2240 = vmatprep.subr.bf16.mxu1 %v2476_v1  ;;  %v2293_v23 = vld [vmem:[%s2522_s24 + $0x34] ss:$8 sps:$4 sm:$0xff]   ;;  %v2297_v25 = vld [vmem:[%s2522_s24 + $0x30] ss:$8 sps:$4 sm:$0xff]   ;;  %v2299_v27 = vld [vmem:[%s2522_s24 + $0x44] ss:$8 sps:$4 sm:$0xff]  }
  0x15   : > { %v2295_v24 = vld [vmem:[%s2522_s24 + $0x234] ss:$8 sps:$4 sm:$0xff]   ;;  %v2298_v26 = vld [vmem:[%s2522_s24 + $0x230] ss:$8 sps:$4 sm:$0xff]   ;;  %v2301_v28 = vld [vmem:[%s2522_s24 + $0x244] ss:$8 sps:$4 sm:$0xff]  }
  0x16   : > { %v2303_v29 = vld [vmem:[%s2522_s24 + $0x40] ss:$8 sps:$4 sm:$0xff]   ;;  %v2305_v31 = vld [vmem:[%s2522_s24 + $0x54] ss:$8 sps:$4 sm:$0xff]   ;;  %v2309_v33 = vld [vmem:[%s2522_s24 + $0x50] ss:$8 sps:$4 sm:$0xff]  }
  0x17   : > { %1171 = vmatpush1.bf16.msra.mxu0 %v2269_v7  ;;  %2250 = vmatpush1.bf16.msra.mxu1 %v2269_v7  ;;  %v2304_v30 = vld [vmem:[%s2522_s24 + $0x240] ss:$8 sps:$4 sm:$0xff]   ;;  %v2307_v32 = vld [vmem:[%s2522_s24 + $0x254] ss:$8 sps:$4 sm:$0xff]   ;;  %v2310_v34 = vld [vmem:[%s2522_s24 + $0x250] ss:$8 sps:$4 sm:$0xff]  }
  0x18   : > { %1172 = vmatprep.subr.bf16.mxu0 %v2476_v1  ;;  %2241 = vmatprep.subr.bf16.mxu1 %v2476_v1  ;;  %v2311_v35 = vld [vmem:[%s2522_s24 + $0x64] ss:$8 sps:$4 sm:$0xff]   ;;  %v2315_v37 = vld [vmem:[%s2522_s24 + $0x60] ss:$8 sps:$4 sm:$0xff]   ;;  %v2317_v39 = vld [vmem:[%s2522_s24 + $0x74] ss:$8 sps:$4 sm:$0xff]  }
  0x19   : > { %v2313_v36 = vld [vmem:[%s2522_s24 + $0x264] ss:$8 sps:$4 sm:$0xff]   ;;  %v2316_v38 = vld [vmem:[%s2522_s24 + $0x260] ss:$8 sps:$4 sm:$0xff]   ;;  %v2319_v40 = vld [vmem:[%s2522_s24 + $0x274] ss:$8 sps:$4 sm:$0xff]  }
  0x1a   : > { %v2321_v41 = vld [vmem:[%s2522_s24 + $0x70] ss:$8 sps:$4 sm:$0xff]   ;;  %v2323_v43 = vld [vmem:[%s2522_s24 + $0x84] ss:$8 sps:$4 sm:$0xff]   ;;  %v2327_v45 = vld [vmem:[%s2522_s24 + $0x80] ss:$8 sps:$4 sm:$0xff]  }
  0x1b   : > { %1173 = vmatpush1.bf16.msra.mxu0 %v2270_v8  ;;  %2251 = vmatpush1.bf16.msra.mxu1 %v2270_v8  ;;  %v2322_v42 = vld [vmem:[%s2522_s24 + $0x270] ss:$8 sps:$4 sm:$0xff]   ;;  %v2325_v44 = vld [vmem:[%s2522_s24 + $0x284] ss:$8 sps:$4 sm:$0xff]   ;;  %v2328_v46 = vld [vmem:[%s2522_s24 + $0x280] ss:$8 sps:$4 sm:$0xff]  }
  0x1c   : > { %1174 = vmatprep.subr.bf16.mxu0 %v2476_v1  ;;  %2242 = vmatprep.subr.bf16.mxu1 %v2476_v1  ;;  %v2329_v47 = vld [vmem:[%s2522_s24 + $0x94] ss:$8 sps:$4 sm:$0xff]   ;;  %v2333_v49 = vld [vmem:[%s2522_s24 + $0x90] ss:$8 sps:$4 sm:$0xff]   ;;  %v2335_v51 = vld [vmem:[%s2522_s24 + $0xa4] ss:$8 sps:$4 sm:$0xff]  }
  0x1d   : > { %v2331_v48 = vld [vmem:[%s2522_s24 + $0x294] ss:$8 sps:$4 sm:$0xff]   ;;  %v2334_v50 = vld [vmem:[%s2522_s24 + $0x290] ss:$8 sps:$4 sm:$0xff]   ;;  %v2337_v52 = vld [vmem:[%s2522_s24 + $0x2a4] ss:$8 sps:$4 sm:$0xff]  }
  0x1e   : > { %v2339_v53 = vld [vmem:[%s2522_s24 + $0xa0] ss:$8 sps:$4 sm:$0xff]   ;;  %v2341_v55 = vld [vmem:[%s2522_s24 + $0xb4] ss:$8 sps:$4 sm:$0xff]   ;;  %v2345_v57 = vld [vmem:[%s2522_s24 + $0xb0] ss:$8 sps:$4 sm:$0xff]  }
  0x1f   : > { %1175 = vmatpush1.bf16.msra.mxu0 %v2271_v9  ;;  %2252 = vmatpush1.bf16.msra.mxu1 %v2271_v9  ;;  %v2340_v54 = vld [vmem:[%s2522_s24 + $0x2a0] ss:$8 sps:$4 sm:$0xff]   ;;  %v2343_v56 = vld [vmem:[%s2522_s24 + $0x2b4] ss:$8 sps:$4 sm:$0xff]   ;;  %v2346_v58 = vld [vmem:[%s2522_s24 + $0x2b0] ss:$8 sps:$4 sm:$0xff]  }
  0x20   : > { %1176 = vmatprep.subr.bf16.mxu0 %v2476_v1  ;;  %2243 = vmatprep.subr.bf16.mxu1 %v2476_v1  ;;  %v2347_v59 = vld [vmem:[%s2522_s24 + $0xc4] ss:$8 sps:$4 sm:$0xff]   ;;  %v2351_v61 = vld [vmem:[%s2522_s24 + $0xc0] ss:$8 sps:$4 sm:$0xff]   ;;  %v2353_v63 = vld [vmem:[%s2522_s24 + $0xd4] ss:$8 sps:$4 sm:$0xff]  }
  0x21   : > { %v2349_v60 = vld [vmem:[%s2522_s24 + $0x2c4] ss:$8 sps:$4 sm:$0xff]   ;;  %v2352_v62 = vld [vmem:[%s2522_s24 + $0x2c0] ss:$8 sps:$4 sm:$0xff]   ;;  %v2355_v0 = vld [vmem:[%s2522_s24 + $0x2d4] ss:$8 sps:$4 sm:$0xff]  }
  0x22   : > { %v2358_v2 = vld [vmem:[%s2522_s24 + $0x2d0] ss:$8 sps:$4 sm:$0xff]   ;;  %v2359_v3 = vld [vmem:[%s2522_s24 + $0xe4] ss:$8 sps:$4 sm:$0xff]   ;;  %v2363_v5 = vld [vmem:[%s2522_s24 + $0xe0] ss:$8 sps:$4 sm:$0xff]  }
  0x23   : > { %1177 = vmatpush1.bf16.msra.mxu0 %v2272_v10  ;;  %2253 = vmatpush1.bf16.msra.mxu1 %v2272_v10  ;;  %v2361_v4 = vld [vmem:[%s2522_s24 + $0x2e4] ss:$8 sps:$4 sm:$0xff]   ;;  %v2364_v6 = vld [vmem:[%s2522_s24 + $0x2e0] ss:$8 sps:$4 sm:$0xff]   ;;  %v2365_v7 = vld [vmem:[%s2522_s24 + $0xf4] ss:$8 sps:$4 sm:$0xff]  }
  0x24   : > { %1178 = vmatprep.subr.bf16.mxu0 %v2476_v1  ;;  %2244 = vmatprep.subr.bf16.mxu1 %v2476_v1  ;;  %v2367_v8 = vld [vmem:[%s2522_s24 + $0x2f4] ss:$8 sps:$4 sm:$0xff]   ;;  %v2369_v9 = vld [vmem:[%s2522_s24 + $0xf0] ss:$8 sps:$4 sm:$0xff]  }
  0x25   : > { %v2370_v10 = vld [vmem:[%s2522_s24 + $0x2f0] ss:$8 sps:$4 sm:$0xff]  }
  0x27   : > { %1179 = vmatpush1.bf16.msra.mxu0 %v2273_v11  ;;  %2254 = vmatpush1.bf16.msra.mxu1 %v2273_v11  ;;  %v2371_v11 = vld [vmem:[%s2522_s24 + $0x104] ss:$8 sps:$4 sm:$0xff]  }
  0x28   : > { %1180 = vmatprep.subr.bf16.mxu0 %v2476_v1  ;;  %2245 = vmatprep.subr.bf16.mxu1 %v2476_v1  ;;  %v2357_v1 = vld [vmem:[%s2522_s24 + $0xd0] ss:$8 sps:$4 sm:$0xff]  }
  0x2b   : > { %1181 = vmatpush1.bf16.msra.mxu0 %v2274_v12  ;;  %2255 = vmatpush1.bf16.msra.mxu1 %v2274_v12  ;;  %v2373_v12 = vld [vmem:[%s2522_s24 + $0x304] ss:$8 sps:$4 sm:$0xff]  }
  0x2e   : > { %1195 = vmatmul.mubr.bf16.vlgmr.msra.gmra.mrb[0].mxu0 %v2275_v13  ;;  %1451 = vmatmul.mubr.bf16.vlgmr.msra.gmra.mrb[0].mxu1 %v2278_v14  ;;  %v2375_v13 = vld [vmem:[%s2522_s24 + $0x100] ss:$8 sps:$4 sm:$0xff]  }
  0x2f   : > { %2170 = vmatprep.mubr.msk.bf16.mxu0 %vm969_vm0, %v2281_v15  ;;  %2202 = vmatprep.mubr.msk.bf16.mxu1 %vm969_vm0, %v2283_v16  ;;  %v2376_v14 = vld [vmem:[%s2522_s24 + $0x300] ss:$8 sps:$4 sm:$0xff]   ;;  %v2377_v15 = vld [vmem:[%s2522_s24 + $0x114] ss:$8 sps:$4 sm:$0xff]  }
  0x30   : > { %v2379_v16 = vld [vmem:[%s2522_s24 + $0x314] ss:$8 sps:$4 sm:$0xff]  }
  0x36   : > { %1203 = vmatmul.mubr.bf16.gmra.mrb[4].mxu0 %v2285_v17  ;;  %1459 = vmatmul.mubr.bf16.gmra.mrb[4].mxu1 %v2286_v18  ;;  %v2381_v17 = vld [vmem:[%s2522_s24 + $0x110] ss:$8 sps:$4 sm:$0xff]  }
  0x37   : > { %2171 = vmatprep.mubr.msk.bf16.mxu0 %vm969_vm0, %v2287_v19  ;;  %2203 = vmatprep.mubr.msk.bf16.mxu1 %vm969_vm0, %v2289_v20  ;;  %v2382_v18 = vld [vmem:[%s2522_s24 + $0x310] ss:$8 sps:$4 sm:$0xff]   ;;  %v2383_v19 = vld [vmem:[%s2522_s24 + $0x124] ss:$8 sps:$4 sm:$0xff]  }
  0x38   : > { %v2385_v20 = vld [vmem:[%s2522_s24 + $0x324] ss:$8 sps:$4 sm:$0xff]  }
  0x3e   : > { %1211 = vmatmul.mubr.bf16.gmra.mrb[8].mxu0 %v2291_v21  ;;  %1467 = vmatmul.mubr.bf16.gmra.mrb[8].mxu1 %v2292_v22  ;;  %v2387_v21 = vld [vmem:[%s2522_s24 + $0x120] ss:$8 sps:$4 sm:$0xff]  }
  0x3f   : > { %2172 = vmatprep.mubr.msk.bf16.mxu0 %vm969_vm0, %v2293_v23  ;;  %2204 = vmatprep.mubr.msk.bf16.mxu1 %vm969_vm0, %v2295_v24  ;;  %v2388_v22 = vld [vmem:[%s2522_s24 + $0x320] ss:$8 sps:$4 sm:$0xff]   ;;  %v2389_v23 = vld [vmem:[%s2522_s24 + $0x134] ss:$8 sps:$4 sm:$0xff]  }
  0x40   : > { %v2391_v24 = vld [vmem:[%s2522_s24 + $0x334] ss:$8 sps:$4 sm:$0xff]  }
  0x46   : > { %1219 = vmatmul.mubr.bf16.gmra.mrb[12].mxu0 %v2297_v25  ;;  %1475 = vmatmul.mubr.bf16.gmra.mrb[12].mxu1 %v2298_v26  ;;  %v2393_v25 = vld [vmem:[%s2522_s24 + $0x130] ss:$8 sps:$4 sm:$0xff]  }
  0x47   : > { %2173 = vmatprep.mubr.msk.bf16.mxu0 %vm969_vm0, %v2299_v27  ;;  %2205 = vmatprep.mubr.msk.bf16.mxu1 %vm969_vm0, %v2301_v28  ;;  %v2394_v26 = vld [vmem:[%s2522_s24 + $0x330] ss:$8 sps:$4 sm:$0xff]   ;;  %v2395_v27 = vld [vmem:[%s2522_s24 + $0x144] ss:$8 sps:$4 sm:$0xff]  }
  0x48   : > { %v2397_v28 = vld [vmem:[%s2522_s24 + $0x344] ss:$8 sps:$4 sm:$0xff]  }
  0x4e   : > { %1227 = vmatmul.mubr.bf16.gmra.mrb[16].mxu0 %v2303_v29  ;;  %1483 = vmatmul.mubr.bf16.gmra.mrb[16].mxu1 %v2304_v30  ;;  %v2399_v29 = vld [vmem:[%s2522_s24 + $0x140] ss:$8 sps:$4 sm:$0xff]  }
  0x4f   : > { %2174 = vmatprep.mubr.msk.bf16.mxu0 %vm969_vm0, %v2305_v31  ;;  %2206 = vmatprep.mubr.msk.bf16.mxu1 %vm969_vm0, %v2307_v32  ;;  %v2400_v30 = vld [vmem:[%s2522_s24 + $0x340] ss:$8 sps:$4 sm:$0xff]   ;;  %v2401_v31 = vld [vmem:[%s2522_s24 + $0x154] ss:$8 sps:$4 sm:$0xff]  }
  0x50   : > { %v2403_v32 = vld [vmem:[%s2522_s24 + $0x354] ss:$8 sps:$4 sm:$0xff]  }
  0x56   : > { %1235 = vmatmul.mubr.bf16.gmra.mrb[20].mxu0 %v2309_v33  ;;  %1491 = vmatmul.mubr.bf16.gmra.mrb[20].mxu1 %v2310_v34  ;;  %v2405_v33 = vld [vmem:[%s2522_s24 + $0x150] ss:$8 sps:$4 sm:$0xff]  }
  0x57   : > { %2175 = vmatprep.mubr.msk.bf16.mxu0 %vm969_vm0, %v2311_v35  ;;  %2207 = vmatprep.mubr.msk.bf16.mxu1 %vm969_vm0, %v2313_v36  ;;  %v2406_v34 = vld [vmem:[%s2522_s24 + $0x350] ss:$8 sps:$4 sm:$0xff]   ;;  %v2407_v35 = vld [vmem:[%s2522_s24 + $0x164] ss:$8 sps:$4 sm:$0xff]  }
  0x58   : > { %v2409_v36 = vld [vmem:[%s2522_s24 + $0x364] ss:$8 sps:$4 sm:$0xff]  }
  0x5e   : > { %1243 = vmatmul.mubr.bf16.gmra.mrb[24].mxu0 %v2315_v37  ;;  %1499 = vmatmul.mubr.bf16.gmra.mrb[24].mxu1 %v2316_v38  ;;  %v2411_v37 = vld [vmem:[%s2522_s24 + $0x160] ss:$8 sps:$4 sm:$0xff]  }
  0x5f   : > { %2176 = vmatprep.mubr.msk.bf16.mxu0 %vm969_vm0, %v2317_v39  ;;  %2208 = vmatprep.mubr.msk.bf16.mxu1 %vm969_vm0, %v2319_v40  ;;  %v2412_v38 = vld [vmem:[%s2522_s24 + $0x360] ss:$8 sps:$4 sm:$0xff]   ;;  %v2413_v39 = vld [vmem:[%s2522_s24 + $0x174] ss:$8 sps:$4 sm:$0xff]  }
  0x60   : > { %v2415_v40 = vld [vmem:[%s2522_s24 + $0x374] ss:$8 sps:$4 sm:$0xff]  }
  0x66   : > { %1251 = vmatmul.mubr.bf16.gmra.mrb[28].mxu0 %v2321_v41  ;;  %1507 = vmatmul.mubr.bf16.gmra.mrb[28].mxu1 %v2322_v42  ;;  %v2417_v41 = vld [vmem:[%s2522_s24 + $0x170] ss:$8 sps:$4 sm:$0xff]  }
  0x67   : > { %2177 = vmatprep.mubr.msk.bf16.mxu0 %vm969_vm0, %v2323_v43  ;;  %2209 = vmatprep.mubr.msk.bf16.mxu1 %vm969_vm0, %v2325_v44  ;;  %v2418_v42 = vld [vmem:[%s2522_s24 + $0x370] ss:$8 sps:$4 sm:$0xff]   ;;  %v2419_v43 = vld [vmem:[%s2522_s24 + $0x184] ss:$8 sps:$4 sm:$0xff]  }
  0x68   : > { %v2421_v44 = vld [vmem:[%s2522_s24 + $0x384] ss:$8 sps:$4 sm:$0xff]  }
  0x6e   : > { %1259 = vmatmul.mubr.bf16.gmra.mrb[32].mxu0 %v2327_v45  ;;  %1515 = vmatmul.mubr.bf16.gmra.mrb[32].mxu1 %v2328_v46  ;;  %v2423_v45 = vld [vmem:[%s2522_s24 + $0x180] ss:$8 sps:$4 sm:$0xff]  }
  0x6f   : > { %2178 = vmatprep.mubr.msk.bf16.mxu0 %vm969_vm0, %v2329_v47  ;;  %2210 = vmatprep.mubr.msk.bf16.mxu1 %vm969_vm0, %v2331_v48  ;;  %v2424_v46 = vld [vmem:[%s2522_s24 + $0x380] ss:$8 sps:$4 sm:$0xff]   ;;  %v2425_v47 = vld [vmem:[%s2522_s24 + $0x194] ss:$8 sps:$4 sm:$0xff]  }
  0x70   : > { %v2427_v48 = vld [vmem:[%s2522_s24 + $0x394] ss:$8 sps:$4 sm:$0xff]  }
  0x76   : > { %1267 = vmatmul.mubr.bf16.gmra.mrb[36].mxu0 %v2333_v49  ;;  %1523 = vmatmul.mubr.bf16.gmra.mrb[36].mxu1 %v2334_v50  ;;  %v2429_v49 = vld [vmem:[%s2522_s24 + $0x190] ss:$8 sps:$4 sm:$0xff]  }
  0x77   : > { %2179 = vmatprep.mubr.msk.bf16.mxu0 %vm969_vm0, %v2335_v51  ;;  %2211 = vmatprep.mubr.msk.bf16.mxu1 %vm969_vm0, %v2337_v52  ;;  %v2430_v50 = vld [vmem:[%s2522_s24 + $0x390] ss:$8 sps:$4 sm:$0xff]   ;;  %v2431_v51 = vld [vmem:[%s2522_s24 + $0x1a4] ss:$8 sps:$4 sm:$0xff]  }
  0x78   : > { %v2433_v52 = vld [vmem:[%s2522_s24 + $0x3a4] ss:$8 sps:$4 sm:$0xff]  }
  0x7e   : > { %1275 = vmatmul.mubr.bf16.gmra.mrb[40].mxu0 %v2339_v53  ;;  %1531 = vmatmul.mubr.bf16.gmra.mrb[40].mxu1 %v2340_v54  ;;  %v2435_v53 = vld [vmem:[%s2522_s24 + $0x1a0] ss:$8 sps:$4 sm:$0xff]  }
  0x7f   : > { %2180 = vmatprep.mubr.msk.bf16.mxu0 %vm969_vm0, %v2341_v55  ;;  %2212 = vmatprep.mubr.msk.bf16.mxu1 %vm969_vm0, %v2343_v56  ;;  %v2436_v54 = vld [vmem:[%s2522_s24 + $0x3a0] ss:$8 sps:$4 sm:$0xff]   ;;  %v2437_v55 = vld [vmem:[%s2522_s24 + $0x1b4] ss:$8 sps:$4 sm:$0xff]  }
  0x80   : > { %v2439_v56 = vld [vmem:[%s2522_s24 + $0x3b4] ss:$8 sps:$4 sm:$0xff]  }
  0x86   : > { %1283 = vmatmul.mubr.bf16.gmra.mrb[44].mxu0 %v2345_v57  ;;  %1539 = vmatmul.mubr.bf16.gmra.mrb[44].mxu1 %v2346_v58  ;;  %v2712_v57 = vld [vmem:[%s3143_s2] ss:$0 sm:$0xff] }
  0x87   : > { %2181 = vmatprep.mubr.msk.bf16.mxu0 %vm969_vm0, %v2347_v59  ;;  %2213 = vmatprep.mubr.msk.bf16.mxu1 %vm969_vm0, %v2349_v60 }
  0x8e   : > { %1291 = vmatmul.mubr.bf16.gmra.mrb[48].mxu0 %v2351_v61  ;;  %1547 = vmatmul.mubr.bf16.gmra.mrb[48].mxu1 %v2352_v62 }
  0x8f   : > { %2182 = vmatprep.mubr.msk.bf16.mxu0 %vm969_vm0, %v2353_v63  ;;  %2214 = vmatprep.mubr.msk.bf16.mxu1 %vm969_vm0, %v2355_v0  ;;  %v2441_v0 = vld [vmem:[%s2522_s24 + $0x1b0] ss:$8 sps:$4 sm:$0xff]  }
  0x96   : > { %1299 = vmatmul.mubr.bf16.gmra.mrb[52].mxu0 %v2357_v1  ;;  %1555 = vmatmul.mubr.bf16.gmra.mrb[52].mxu1 %v2358_v2  ;;  %v2442_v1 = vld [vmem:[%s2522_s24 + $0x3b0] ss:$8 sps:$4 sm:$0xff]  }
  0x97   : > { %2183 = vmatprep.mubr.msk.bf16.mxu0 %vm969_vm0, %v2359_v3  ;;  %2215 = vmatprep.mubr.msk.bf16.mxu1 %vm969_vm0, %v2361_v4  ;;  %v2443_v4 = vld [vmem:[%s2522_s24 + $0x1c4] ss:$8 sps:$4 sm:$0xff]  }
  0x9e   : > { %1307 = vmatmul.mubr.bf16.gmra.mrb[56].mxu0 %v2363_v5  ;;  %1563 = vmatmul.mubr.bf16.gmra.mrb[56].mxu1 %v2364_v6  ;;  %v2445_v5 = vld [vmem:[%s2522_s24 + $0x3c4] ss:$8 sps:$4 sm:$0xff]  }
  0x9f   : > { %2184 = vmatprep.mubr.msk.bf16.mxu0 %vm969_vm0, %v2365_v7  ;;  %2216 = vmatprep.mubr.msk.bf16.mxu1 %vm969_vm0, %v2367_v8 }
  0xa6   : > { %1315 = vmatmul.mubr.bf16.gmra.mrb[60].mxu0 %v2369_v9  ;;  %1571 = vmatmul.mubr.bf16.gmra.mrb[60].mxu1 %v2370_v10 }
  0xa7   : > { %2185 = vmatprep.mubr.msk.bf16.mxu0 %vm969_vm0, %v2371_v11  ;;  %2217 = vmatprep.mubr.msk.bf16.mxu1 %vm969_vm0, %v2373_v12 }
  0xae   : > { %1323 = vmatmul.mubr.bf16.gmra.mrb[64].mxu0 %v2375_v13  ;;  %1579 = vmatmul.mubr.bf16.gmra.mrb[64].mxu1 %v2376_v14 }
  0xaf   : > { %2186 = vmatprep.mubr.msk.bf16.mxu0 %vm969_vm0, %v2377_v15  ;;  %2218 = vmatprep.mubr.msk.bf16.mxu1 %vm969_vm0, %v2379_v16 }
  0xb6   : > { %1331 = vmatmul.mubr.bf16.gmra.mrb[68].mxu0 %v2381_v17  ;;  %1587 = vmatmul.mubr.bf16.gmra.mrb[68].mxu1 %v2382_v18 }
  0xb7   : > { %2187 = vmatprep.mubr.msk.bf16.mxu0 %vm969_vm0, %v2383_v19  ;;  %2219 = vmatprep.mubr.msk.bf16.mxu1 %vm969_vm0, %v2385_v20  ;;  %v2447_v20 = vld [vmem:[%s2522_s24 + $0x1c0] ss:$8 sps:$4 sm:$0xff]  }
  0xbe   : > { %1339 = vmatmul.mubr.bf16.gmra.mrb[72].mxu0 %v2387_v21  ;;  %1595 = vmatmul.mubr.bf16.gmra.mrb[72].mxu1 %v2388_v22  ;;  %v2448_v21 = vld [vmem:[%s2522_s24 + $0x3c0] ss:$8 sps:$4 sm:$0xff]  }
  0xbf   : > { %2188 = vmatprep.mubr.msk.bf16.mxu0 %vm969_vm0, %v2389_v23  ;;  %2220 = vmatprep.mubr.msk.bf16.mxu1 %vm969_vm0, %v2391_v24  ;;  %v2449_v24 = vld [vmem:[%s2522_s24 + $0x1d4] ss:$8 sps:$4 sm:$0xff]  }
  0xc6   : > { %1347 = vmatmul.mubr.bf16.gmra.mrb[76].mxu0 %v2393_v25  ;;  %1603 = vmatmul.mubr.bf16.gmra.mrb[76].mxu1 %v2394_v26  ;;  %v2451_v25 = vld [vmem:[%s2522_s24 + $0x3d4] ss:$8 sps:$4 sm:$0xff]  }
  0xc7   : > { %2189 = vmatprep.mubr.msk.bf16.mxu0 %vm969_vm0, %v2395_v27  ;;  %2221 = vmatprep.mubr.msk.bf16.mxu1 %vm969_vm0, %v2397_v28 }
  0xce   : > { %1355 = vmatmul.mubr.bf16.gmra.mrb[80].mxu0 %v2399_v29  ;;  %1611 = vmatmul.mubr.bf16.gmra.mrb[80].mxu1 %v2400_v30 }
  0xcf   : > { %2190 = vmatprep.mubr.msk.bf16.mxu0 %vm969_vm0, %v2401_v31  ;;  %2222 = vmatprep.mubr.msk.bf16.mxu1 %vm969_vm0, %v2403_v32 }
  0xd6   : > { %1363 = vmatmul.mubr.bf16.gmra.mrb[84].mxu0 %v2405_v33  ;;  %1619 = vmatmul.mubr.bf16.gmra.mrb[84].mxu1 %v2406_v34 }
  0xd7   : > { %2191 = vmatprep.mubr.msk.bf16.mxu0 %vm969_vm0, %v2407_v35  ;;  %2223 = vmatprep.mubr.msk.bf16.mxu1 %vm969_vm0, %v2409_v36 }
  0xde   : > { %1371 = vmatmul.mubr.bf16.gmra.mrb[88].mxu0 %v2411_v37  ;;  %1627 = vmatmul.mubr.bf16.gmra.mrb[88].mxu1 %v2412_v38 }
  0xdf   : > { %2192 = vmatprep.mubr.msk.bf16.mxu0 %vm969_vm0, %v2413_v39  ;;  %2224 = vmatprep.mubr.msk.bf16.mxu1 %vm969_vm0, %v2415_v40  ;;  %v2453_v40 = vld [vmem:[%s2522_s24 + $0x1d0] ss:$8 sps:$4 sm:$0xff]  }
  0xe6   : > { %1379 = vmatmul.mubr.bf16.gmra.mrb[92].mxu0 %v2417_v41  ;;  %1635 = vmatmul.mubr.bf16.gmra.mrb[92].mxu1 %v2418_v42  ;;  %v2454_v41 = vld [vmem:[%s2522_s24 + $0x3d0] ss:$8 sps:$4 sm:$0xff]  }
  0xe7   : > { %2193 = vmatprep.mubr.msk.bf16.mxu0 %vm969_vm0, %v2419_v43  ;;  %2225 = vmatprep.mubr.msk.bf16.mxu1 %vm969_vm0, %v2421_v44  ;;  %v2455_v44 = vld [vmem:[%s2522_s24 + $0x1e4] ss:$8 sps:$4 sm:$0xff]  }
  0xee   : > { %1387 = vmatmul.mubr.bf16.gmra.mrb[96].mxu0 %v2423_v45  ;;  %1643 = vmatmul.mubr.bf16.gmra.mrb[96].mxu1 %v2424_v46  ;;  %v2457_v45 = vld [vmem:[%s2522_s24 + $0x3e4] ss:$8 sps:$4 sm:$0xff]  }
  0xef   : > { %2194 = vmatprep.mubr.msk.bf16.mxu0 %vm969_vm0, %v2425_v47  ;;  %2226 = vmatprep.mubr.msk.bf16.mxu1 %vm969_vm0, %v2427_v48 }
  0xf6   : > { %1395 = vmatmul.mubr.bf16.gmra.mrb[100].mxu0 %v2429_v49  ;;  %1651 = vmatmul.mubr.bf16.gmra.mrb[100].mxu1 %v2430_v50 }
  0xf7   : > { %2195 = vmatprep.mubr.msk.bf16.mxu0 %vm969_vm0, %v2431_v51  ;;  %2227 = vmatprep.mubr.msk.bf16.mxu1 %vm969_vm0, %v2433_v52 }
  0xfe   : > { %1403 = vmatmul.mubr.bf16.gmra.mrb[104].mxu0 %v2435_v53  ;;  %1659 = vmatmul.mubr.bf16.gmra.mrb[104].mxu1 %v2436_v54 }
  0xff   : > { %2196 = vmatprep.mubr.msk.bf16.mxu0 %vm969_vm0, %v2437_v55  ;;  %2228 = vmatprep.mubr.msk.bf16.mxu1 %vm969_vm0, %v2439_v56 }
 0x101   : > { %v1196_v58 = vpop.f32.mrb[0].mxu0  ;;  %v1452_v59 = vpop.f32.mrb[0].mxu1 }
 0x102   : > { %v1197_v60 = vadd.f32 %v2712_v57, %v1196_v58  ;;  %v1453_v61 = vadd.f32 %v2712_v57, %v1452_v59  ;;  %v1198_v62 = vpop.f32.mrb[1].mxu0  ;;  %v1454_v63 = vpop.f32.mrb[1].mxu1 }
 0x103   : > { %v1199_v2 = vpop.f32.mrb[2].mxu0  ;;  %v1455_v3 = vpop.f32.mrb[2].mxu1  ;;  %v2460_v62 = vld [vmem:[%s2522_s24 + $0x3e0] ss:$8 sps:$4 sm:$0xff]  }
 0x104   : > { %v1707_v6 = vmax.f32 %v1197_v60, 0.0  ;;  %v1771_v7 = vmax.f32 %v1453_v61, 0.0  ;;  %v1200_v8 = vadd.f32 %v2712_v57, %v1199_v2  ;;  %v1456_v9 = vadd.f32 %v2712_v57, %v1455_v3  ;;  %v1201_v10 = vpop.f32.mrb[3].mxu0  ;;  %v1457_v11 = vpop.f32.mrb[3].mxu1  ;;  %v2459_v61 = vld [vmem:[%s2522_s24 + $0x1e0] ss:$8 sps:$4 sm:$0xff]  }
 0x105   : > { %v2463_v2 = vld [vmem:[%s2522_s24 + $0x3f4] ss:$8 sps:$4 sm:$0xff]  }
 0x106   : > { %1836 = vst.msk [vmem:[%s2725_s18] sm:$0xff] %vm1835_vm1, %v1707_v6  ;;  %1900 = vst.msk [vmem:[%s2725_s18 + $0x200] sm:$0xff] %vm1835_vm1, %v1771_v7  ;;  %v1708_v12 = vmax.f32 %v1200_v8, 0.0  ;;  %v1772_v13 = vmax.f32 %v1456_v9, 0.0  ;;  %1411 = vmatmul.mubr.bf16.gmra.mrb[108].mxu0 %v2441_v0  ;;  %1667 = vmatmul.mubr.bf16.gmra.mrb[108].mxu1 %v2442_v1  ;;  %v2461_v1 = vld [vmem:[%s2522_s24 + $0x1f4] ss:$8 sps:$4 sm:$0xff]  }
 0x107   : > { %2197 = vmatprep.mubr.msk.bf16.mxu0 %vm969_vm0, %v2443_v4  ;;  %2229 = vmatprep.mubr.msk.bf16.mxu1 %vm969_vm0, %v2445_v5 }
 0x108   : > { %1837 = vst.msk [vmem:[%s2725_s18 + $0x8] sm:$0xff] %vm1835_vm1, %v1708_v12  ;;  %1901 = vst.msk [vmem:[%s2725_s18 + $0x208] sm:$0xff] %vm1835_vm1, %v1772_v13 }
 0x109   : > { %v1204_v14 = vpop.f32.mrb[4].mxu0  ;;  %v1460_v15 = vpop.f32.mrb[4].mxu1 }
 0x10a   : > { %v1205_v16 = vadd.f32 %v2712_v57, %v1204_v14  ;;  %v1461_v17 = vadd.f32 %v2712_v57, %v1460_v15  ;;  %v1206_v18 = vpop.f32.mrb[5].mxu0  ;;  %v1462_v19 = vpop.f32.mrb[5].mxu1 }
 0x10b   : > { %v1207_v22 = vpop.f32.mrb[6].mxu0  ;;  %v1463_v23 = vpop.f32.mrb[6].mxu1  ;;  %v2466_v18 = vld [vmem:[%s2522_s24 + $0x3f0] ss:$8 sps:$4 sm:$0xff]  }
 0x10c   : > { %v1709_v26 = vmax.f32 %v1205_v16, 0.0  ;;  %v1773_v27 = vmax.f32 %v1461_v17, 0.0  ;;  %v1208_v28 = vadd.f32 %v2712_v57, %v1207_v22  ;;  %v1464_v29 = vadd.f32 %v2712_v57, %v1463_v23  ;;  %v1209_v30 = vpop.f32.mrb[7].mxu0  ;;  %v1465_v31 = vpop.f32.mrb[7].mxu1  ;;  %v2465_v17 = vld [vmem:[%s2522_s24 + $0x1f0] ss:$8 sps:$4 sm:$0xff]  }
 0x10e   : > { %1838 = vst.msk [vmem:[%s2725_s18 + $0x10] sm:$0xff] %vm1835_vm1, %v1709_v26  ;;  %1902 = vst.msk [vmem:[%s2725_s18 + $0x210] sm:$0xff] %vm1835_vm1, %v1773_v27  ;;  %v1710_v32 = vmax.f32 %v1208_v28, 0.0  ;;  %v1774_v33 = vmax.f32 %v1464_v29, 0.0  ;;  %1419 = vmatmul.mubr.bf16.gmra.mrb[112].mxu0 %v2447_v20  ;;  %1675 = vmatmul.mubr.bf16.gmra.mrb[112].mxu1 %v2448_v21 }
 0x10f   : > { %2198 = vmatprep.mubr.msk.bf16.mxu0 %vm969_vm0, %v2449_v24  ;;  %2230 = vmatprep.mubr.msk.bf16.mxu1 %vm969_vm0, %v2451_v25 }
 0x110   : > { %1839 = vst.msk [vmem:[%s2725_s18 + $0x18] sm:$0xff] %vm1835_vm1, %v1710_v32  ;;  %1903 = vst.msk [vmem:[%s2725_s18 + $0x218] sm:$0xff] %vm1835_vm1, %v1774_v33 }
 0x111   : > { %v1212_v34 = vpop.f32.mrb[8].mxu0  ;;  %v1468_v35 = vpop.f32.mrb[8].mxu1 }
 0x112   : > { %v1213_v36 = vadd.f32 %v2712_v57, %v1212_v34  ;;  %v1469_v37 = vadd.f32 %v2712_v57, %v1468_v35  ;;  %v1214_v38 = vpop.f32.mrb[9].mxu0  ;;  %v1470_v39 = vpop.f32.mrb[9].mxu1 }
 0x113   : > { %v1215_v42 = vpop.f32.mrb[10].mxu0  ;;  %v1471_v43 = vpop.f32.mrb[10].mxu1 }
 0x114   : > { %v1711_v46 = vmax.f32 %v1213_v36, 0.0  ;;  %v1775_v47 = vmax.f32 %v1469_v37, 0.0  ;;  %v1216_v48 = vadd.f32 %v2712_v57, %v1215_v42  ;;  %v1472_v49 = vadd.f32 %v2712_v57, %v1471_v43  ;;  %v1217_v50 = vpop.f32.mrb[11].mxu0  ;;  %v1473_v51 = vpop.f32.mrb[11].mxu1 }
 0x116   : > { %1840 = vst.msk [vmem:[%s2725_s18 + $0x20] sm:$0xff] %vm1835_vm1, %v1711_v46  ;;  %1904 = vst.msk [vmem:[%s2725_s18 + $0x220] sm:$0xff] %vm1835_vm1, %v1775_v47  ;;  %v1712_v52 = vmax.f32 %v1216_v48, 0.0  ;;  %v1776_v53 = vmax.f32 %v1472_v49, 0.0  ;;  %1427 = vmatmul.mubr.bf16.gmra.mrb[116].mxu0 %v2453_v40  ;;  %1683 = vmatmul.mubr.bf16.gmra.mrb[116].mxu1 %v2454_v41 }
 0x117   : > { %2199 = vmatprep.mubr.msk.bf16.mxu0 %vm969_vm0, %v2455_v44  ;;  %2231 = vmatprep.mubr.msk.bf16.mxu1 %vm969_vm0, %v2457_v45 }
 0x118   : > { %1841 = vst.msk [vmem:[%s2725_s18 + $0x28] sm:$0xff] %vm1835_vm1, %v1712_v52  ;;  %1905 = vst.msk [vmem:[%s2725_s18 + $0x228] sm:$0xff] %vm1835_vm1, %v1776_v53 }
 0x119   : > { %v1220_v54 = vpop.f32.mrb[12].mxu0  ;;  %v1476_v55 = vpop.f32.mrb[12].mxu1 }
 0x11a   : > { %v1221_v56 = vadd.f32 %v2712_v57, %v1220_v54  ;;  %v1477_v58 = vadd.f32 %v2712_v57, %v1476_v55  ;;  %v1222_v59 = vpop.f32.mrb[13].mxu0  ;;  %v1478_v60 = vpop.f32.mrb[13].mxu1 }
 0x11b   : > { %v1223_v63 = vpop.f32.mrb[14].mxu0  ;;  %v1479_v0 = vpop.f32.mrb[14].mxu1 }
 0x11c   : > { %v1713_v3 = vmax.f32 %v1221_v56, 0.0  ;;  %v1777_v4 = vmax.f32 %v1477_v58, 0.0  ;;  %v1224_v5 = vadd.f32 %v2712_v57, %v1223_v63  ;;  %v1480_v6 = vadd.f32 %v2712_v57, %v1479_v0  ;;  %v1225_v7 = vpop.f32.mrb[15].mxu0  ;;  %v1481_v8 = vpop.f32.mrb[15].mxu1 }
 0x11e   : > { %1842 = vst.msk [vmem:[%s2725_s18 + $0x30] sm:$0xff] %vm1835_vm1, %v1713_v3  ;;  %1906 = vst.msk [vmem:[%s2725_s18 + $0x230] sm:$0xff] %vm1835_vm1, %v1777_v4  ;;  %v1714_v9 = vmax.f32 %v1224_v5, 0.0  ;;  %v1778_v10 = vmax.f32 %v1480_v6, 0.0  ;;  %1435 = vmatmul.mubr.bf16.gmra.mrb[120].mxu0 %v2459_v61  ;;  %1691 = vmatmul.mubr.bf16.gmra.mrb[120].mxu1 %v2460_v62 }
 0x11f   : > { %2200 = vmatprep.mubr.msk.bf16.mxu0 %vm969_vm0, %v2461_v1  ;;  %2232 = vmatprep.mubr.msk.bf16.mxu1 %vm969_vm0, %v2463_v2 }
 0x120   : > { %1843 = vst.msk [vmem:[%s2725_s18 + $0x38] sm:$0xff] %vm1835_vm1, %v1714_v9  ;;  %1907 = vst.msk [vmem:[%s2725_s18 + $0x238] sm:$0xff] %vm1835_vm1, %v1778_v10 }
 0x121   : > { %v1228_v11 = vpop.f32.mrb[16].mxu0  ;;  %v1484_v12 = vpop.f32.mrb[16].mxu1 }
 0x122   : > { %v1229_v13 = vadd.f32 %v2712_v57, %v1228_v11  ;;  %v1485_v14 = vadd.f32 %v2712_v57, %v1484_v12  ;;  %v1230_v15 = vpop.f32.mrb[17].mxu0  ;;  %v1486_v16 = vpop.f32.mrb[17].mxu1 }
 0x123   : > { %v1231_v19 = vpop.f32.mrb[18].mxu0  ;;  %v1487_v20 = vpop.f32.mrb[18].mxu1 }
 0x124   : > { %v1715_v21 = vmax.f32 %v1229_v13, 0.0  ;;  %v1779_v22 = vmax.f32 %v1485_v14, 0.0  ;;  %v1232_v23 = vadd.f32 %v2712_v57, %v1231_v19  ;;  %v1488_v24 = vadd.f32 %v2712_v57, %v1487_v20  ;;  %v1233_v25 = vpop.f32.mrb[19].mxu0  ;;  %v1489_v26 = vpop.f32.mrb[19].mxu1 }
 0x126   : > { %1844 = vst.msk [vmem:[%s2725_s18 + $0x40] sm:$0xff] %vm1835_vm1, %v1715_v21  ;;  %1908 = vst.msk [vmem:[%s2725_s18 + $0x240] sm:$0xff] %vm1835_vm1, %v1779_v22  ;;  %v1716_v27 = vmax.f32 %v1232_v23, 0.0  ;;  %v1780_v28 = vmax.f32 %v1488_v24, 0.0  ;;  %1443 = vmatmul.mubr.bf16.gmra.mrb[124].mxu0 %v2465_v17  ;;  %1699 = vmatmul.mubr.bf16.gmra.mrb[124].mxu1 %v2466_v18 }
 0x128   : > { %1845 = vst.msk [vmem:[%s2725_s18 + $0x48] sm:$0xff] %vm1835_vm1, %v1716_v27  ;;  %1909 = vst.msk [vmem:[%s2725_s18 + $0x248] sm:$0xff] %vm1835_vm1, %v1780_v28 }
 0x129   : > { %v1236_v29 = vpop.f32.mrb[20].mxu0  ;;  %v1492_v30 = vpop.f32.mrb[20].mxu1 }
 0x12a   : > { %v1237_v31 = vadd.f32 %v2712_v57, %v1236_v29  ;;  %v1493_v32 = vadd.f32 %v2712_v57, %v1492_v30  ;;  %v1238_v33 = vpop.f32.mrb[21].mxu0  ;;  %v1494_v34 = vpop.f32.mrb[21].mxu1 }
 0x12b   : > { %v1239_v35 = vpop.f32.mrb[22].mxu0  ;;  %v1495_v36 = vpop.f32.mrb[22].mxu1 }
 0x12c   : > { %v1717_v37 = vmax.f32 %v1237_v31, 0.0  ;;  %v1781_v38 = vmax.f32 %v1493_v32, 0.0  ;;  %v1240_v39 = vadd.f32 %v2712_v57, %v1239_v35  ;;  %v1496_v40 = vadd.f32 %v2712_v57, %v1495_v36  ;;  %v1241_v41 = vpop.f32.mrb[23].mxu0  ;;  %v1497_v42 = vpop.f32.mrb[23].mxu1 }
 0x12e   : > { %1846 = vst.msk [vmem:[%s2725_s18 + $0x50] sm:$0xff] %vm1835_vm1, %v1717_v37  ;;  %1910 = vst.msk [vmem:[%s2725_s18 + $0x250] sm:$0xff] %vm1835_vm1, %v1781_v38  ;;  %v1718_v43 = vmax.f32 %v1240_v39, 0.0  ;;  %v1782_v44 = vmax.f32 %v1496_v40, 0.0 }
 0x130   : > { %1847 = vst.msk [vmem:[%s2725_s18 + $0x58] sm:$0xff] %vm1835_vm1, %v1718_v43  ;;  %1911 = vst.msk [vmem:[%s2725_s18 + $0x258] sm:$0xff] %vm1835_vm1, %v1782_v44 }
 0x131   : > { %v1244_v45 = vpop.f32.mrb[24].mxu0  ;;  %v1500_v46 = vpop.f32.mrb[24].mxu1 }
 0x132   : > { %v1245_v47 = vadd.f32 %v2712_v57, %v1244_v45  ;;  %v1501_v48 = vadd.f32 %v2712_v57, %v1500_v46  ;;  %v1246_v49 = vpop.f32.mrb[25].mxu0  ;;  %v1502_v50 = vpop.f32.mrb[25].mxu1 }
 0x133   : > { %v1247_v51 = vpop.f32.mrb[26].mxu0  ;;  %v1503_v52 = vpop.f32.mrb[26].mxu1 }
 0x134   : > { %v1719_v53 = vmax.f32 %v1245_v47, 0.0  ;;  %v1783_v54 = vmax.f32 %v1501_v48, 0.0  ;;  %v1248_v55 = vadd.f32 %v2712_v57, %v1247_v51  ;;  %v1504_v56 = vadd.f32 %v2712_v57, %v1503_v52  ;;  %v1249_v58 = vpop.f32.mrb[27].mxu0  ;;  %v1505_v59 = vpop.f32.mrb[27].mxu1 }
 0x136   : > { %1848 = vst.msk [vmem:[%s2725_s18 + $0x60] sm:$0xff] %vm1835_vm1, %v1719_v53  ;;  %1912 = vst.msk [vmem:[%s2725_s18 + $0x260] sm:$0xff] %vm1835_vm1, %v1783_v54  ;;  %v1720_v60 = vmax.f32 %v1248_v55, 0.0  ;;  %v1784_v61 = vmax.f32 %v1504_v56, 0.0 }
 0x138   : > { %1849 = vst.msk [vmem:[%s2725_s18 + $0x68] sm:$0xff] %vm1835_vm1, %v1720_v60  ;;  %1913 = vst.msk [vmem:[%s2725_s18 + $0x268] sm:$0xff] %vm1835_vm1, %v1784_v61 }
 0x139   : > { %v1252_v62 = vpop.f32.mrb[28].mxu0  ;;  %v1508_v63 = vpop.f32.mrb[28].mxu1 }
 0x13a   : > { %v1253_v0 = vadd.f32 %v2712_v57, %v1252_v62  ;;  %v1509_v1 = vadd.f32 %v2712_v57, %v1508_v63  ;;  %v1254_v2 = vpop.f32.mrb[29].mxu0  ;;  %v1510_v3 = vpop.f32.mrb[29].mxu1 }
 0x13b   : > { %v1255_v4 = vpop.f32.mrb[30].mxu0  ;;  %v1511_v5 = vpop.f32.mrb[30].mxu1 }
 0x13c   : > { %v1721_v6 = vmax.f32 %v1253_v0, 0.0  ;;  %v1785_v7 = vmax.f32 %v1509_v1, 0.0  ;;  %v1256_v8 = vadd.f32 %v2712_v57, %v1255_v4  ;;  %v1512_v9 = vadd.f32 %v2712_v57, %v1511_v5  ;;  %v1257_v10 = vpop.f32.mrb[31].mxu0  ;;  %v1513_v11 = vpop.f32.mrb[31].mxu1 }
 0x13e   : > { %1850 = vst.msk [vmem:[%s2725_s18 + $0x70] sm:$0xff] %vm1835_vm1, %v1721_v6  ;;  %1914 = vst.msk [vmem:[%s2725_s18 + $0x270] sm:$0xff] %vm1835_vm1, %v1785_v7  ;;  %v1722_v12 = vmax.f32 %v1256_v8, 0.0  ;;  %v1786_v13 = vmax.f32 %v1512_v9, 0.0 }
 0x140   : > { %1851 = vst.msk [vmem:[%s2725_s18 + $0x78] sm:$0xff] %vm1835_vm1, %v1722_v12  ;;  %1915 = vst.msk [vmem:[%s2725_s18 + $0x278] sm:$0xff] %vm1835_vm1, %v1786_v13 }
 0x141   : > { %v1260_v14 = vpop.f32.mrb[32].mxu0  ;;  %v1516_v15 = vpop.f32.mrb[32].mxu1 }
 0x142   : > { %v1261_v16 = vadd.f32 %v2712_v57, %v1260_v14  ;;  %v1517_v17 = vadd.f32 %v2712_v57, %v1516_v15  ;;  %v1262_v18 = vpop.f32.mrb[33].mxu0  ;;  %v1518_v19 = vpop.f32.mrb[33].mxu1 }
 0x143   : > { %v1263_v20 = vpop.f32.mrb[34].mxu0  ;;  %v1519_v21 = vpop.f32.mrb[34].mxu1 }
 0x144   : > { %v1723_v22 = vmax.f32 %v1261_v16, 0.0  ;;  %v1787_v23 = vmax.f32 %v1517_v17, 0.0  ;;  %v1264_v24 = vadd.f32 %v2712_v57, %v1263_v20  ;;  %v1520_v25 = vadd.f32 %v2712_v57, %v1519_v21  ;;  %v1265_v26 = vpop.f32.mrb[35].mxu0  ;;  %v1521_v27 = vpop.f32.mrb[35].mxu1 }
 0x146   : > { %1852 = vst.msk [vmem:[%s2725_s18 + $0x80] sm:$0xff] %vm1835_vm1, %v1723_v22  ;;  %1916 = vst.msk [vmem:[%s2725_s18 + $0x280] sm:$0xff] %vm1835_vm1, %v1787_v23  ;;  %v1724_v28 = vmax.f32 %v1264_v24, 0.0  ;;  %v1788_v29 = vmax.f32 %v1520_v25, 0.0 }
 0x148   : > { %1853 = vst.msk [vmem:[%s2725_s18 + $0x88] sm:$0xff] %vm1835_vm1, %v1724_v28  ;;  %1917 = vst.msk [vmem:[%s2725_s18 + $0x288] sm:$0xff] %vm1835_vm1, %v1788_v29 }
 0x149   : > { %v1268_v30 = vpop.f32.mrb[36].mxu0  ;;  %v1524_v31 = vpop.f32.mrb[36].mxu1 }
 0x14a   : > { %v1269_v32 = vadd.f32 %v2712_v57, %v1268_v30  ;;  %v1525_v33 = vadd.f32 %v2712_v57, %v1524_v31  ;;  %v1270_v34 = vpop.f32.mrb[37].mxu0  ;;  %v1526_v35 = vpop.f32.mrb[37].mxu1 }
 0x14b   : > { %v1271_v36 = vpop.f32.mrb[38].mxu0  ;;  %v1527_v37 = vpop.f32.mrb[38].mxu1 }
 0x14c   : > { %v1725_v38 = vmax.f32 %v1269_v32, 0.0  ;;  %v1789_v39 = vmax.f32 %v1525_v33, 0.0  ;;  %v1272_v40 = vadd.f32 %v2712_v57, %v1271_v36  ;;  %v1528_v41 = vadd.f32 %v2712_v57, %v1527_v37  ;;  %v1273_v42 = vpop.f32.mrb[39].mxu0  ;;  %v1529_v43 = vpop.f32.mrb[39].mxu1 }
 0x14e   : > { %1854 = vst.msk [vmem:[%s2725_s18 + $0x90] sm:$0xff] %vm1835_vm1, %v1725_v38  ;;  %1918 = vst.msk [vmem:[%s2725_s18 + $0x290] sm:$0xff] %vm1835_vm1, %v1789_v39  ;;  %v1726_v44 = vmax.f32 %v1272_v40, 0.0  ;;  %v1790_v45 = vmax.f32 %v1528_v41, 0.0 }
 0x150   : > { %1855 = vst.msk [vmem:[%s2725_s18 + $0x98] sm:$0xff] %vm1835_vm1, %v1726_v44  ;;  %1919 = vst.msk [vmem:[%s2725_s18 + $0x298] sm:$0xff] %vm1835_vm1, %v1790_v45 }
 0x151   : > { %v1276_v46 = vpop.f32.mrb[40].mxu0  ;;  %v1532_v47 = vpop.f32.mrb[40].mxu1 }
 0x152   : > { %v1277_v48 = vadd.f32 %v2712_v57, %v1276_v46  ;;  %v1533_v49 = vadd.f32 %v2712_v57, %v1532_v47  ;;  %v1278_v50 = vpop.f32.mrb[41].mxu0  ;;  %v1534_v51 = vpop.f32.mrb[41].mxu1 }
 0x153   : > { %v1279_v52 = vpop.f32.mrb[42].mxu0  ;;  %v1535_v53 = vpop.f32.mrb[42].mxu1 }
 0x154   : > { %v1727_v54 = vmax.f32 %v1277_v48, 0.0  ;;  %v1791_v55 = vmax.f32 %v1533_v49, 0.0  ;;  %v1280_v56 = vadd.f32 %v2712_v57, %v1279_v52  ;;  %v1536_v58 = vadd.f32 %v2712_v57, %v1535_v53  ;;  %v1281_v59 = vpop.f32.mrb[43].mxu0  ;;  %v1537_v60 = vpop.f32.mrb[43].mxu1 }
 0x156   : > { %1856 = vst.msk [vmem:[%s2725_s18 + $0xa0] sm:$0xff] %vm1835_vm1, %v1727_v54  ;;  %1920 = vst.msk [vmem:[%s2725_s18 + $0x2a0] sm:$0xff] %vm1835_vm1, %v1791_v55  ;;  %v1728_v61 = vmax.f32 %v1280_v56, 0.0  ;;  %v1792_v62 = vmax.f32 %v1536_v58, 0.0 }
 0x158   : > { %1857 = vst.msk [vmem:[%s2725_s18 + $0xa8] sm:$0xff] %vm1835_vm1, %v1728_v61  ;;  %1921 = vst.msk [vmem:[%s2725_s18 + $0x2a8] sm:$0xff] %vm1835_vm1, %v1792_v62 }
 0x159   : > { %v1284_v63 = vpop.f32.mrb[44].mxu0  ;;  %v1540_v0 = vpop.f32.mrb[44].mxu1 }
 0x15a   : > { %v1285_v1 = vadd.f32 %v2712_v57, %v1284_v63  ;;  %v1541_v2 = vadd.f32 %v2712_v57, %v1540_v0  ;;  %v1286_v3 = vpop.f32.mrb[45].mxu0  ;;  %v1542_v4 = vpop.f32.mrb[45].mxu1 }
 0x15b   : > { %v1287_v5 = vpop.f32.mrb[46].mxu0  ;;  %v1543_v6 = vpop.f32.mrb[46].mxu1 }
 0x15c   : > { %v1729_v7 = vmax.f32 %v1285_v1, 0.0  ;;  %v1793_v8 = vmax.f32 %v1541_v2, 0.0  ;;  %v1288_v9 = vadd.f32 %v2712_v57, %v1287_v5  ;;  %v1544_v10 = vadd.f32 %v2712_v57, %v1543_v6  ;;  %v1289_v11 = vpop.f32.mrb[47].mxu0  ;;  %v1545_v12 = vpop.f32.mrb[47].mxu1 }
 0x15e   : > { %1858 = vst.msk [vmem:[%s2725_s18 + $0xb0] sm:$0xff] %vm1835_vm1, %v1729_v7  ;;  %1922 = vst.msk [vmem:[%s2725_s18 + $0x2b0] sm:$0xff] %vm1835_vm1, %v1793_v8  ;;  %v1730_v13 = vmax.f32 %v1288_v9, 0.0  ;;  %v1794_v14 = vmax.f32 %v1544_v10, 0.0 }
 0x160   : > { %1859 = vst.msk [vmem:[%s2725_s18 + $0xb8] sm:$0xff] %vm1835_vm1, %v1730_v13  ;;  %1923 = vst.msk [vmem:[%s2725_s18 + $0x2b8] sm:$0xff] %vm1835_vm1, %v1794_v14 }
 0x161   : > { %v1292_v15 = vpop.f32.mrb[48].mxu0  ;;  %v1548_v16 = vpop.f32.mrb[48].mxu1 }
 0x162   : > { %v1293_v17 = vadd.f32 %v2712_v57, %v1292_v15  ;;  %v1549_v18 = vadd.f32 %v2712_v57, %v1548_v16  ;;  %v1294_v19 = vpop.f32.mrb[49].mxu0  ;;  %v1550_v20 = vpop.f32.mrb[49].mxu1 }
 0x163   : > { %v1295_v21 = vpop.f32.mrb[50].mxu0  ;;  %v1551_v22 = vpop.f32.mrb[50].mxu1 }
 0x164   : > { %v1731_v23 = vmax.f32 %v1293_v17, 0.0  ;;  %v1795_v24 = vmax.f32 %v1549_v18, 0.0  ;;  %v1296_v25 = vadd.f32 %v2712_v57, %v1295_v21  ;;  %v1552_v26 = vadd.f32 %v2712_v57, %v1551_v22  ;;  %v1297_v27 = vpop.f32.mrb[51].mxu0  ;;  %v1553_v28 = vpop.f32.mrb[51].mxu1 }
 0x166   : > { %1860 = vst.msk [vmem:[%s2725_s18 + $0xc0] sm:$0xff] %vm1835_vm1, %v1731_v23  ;;  %1924 = vst.msk [vmem:[%s2725_s18 + $0x2c0] sm:$0xff] %vm1835_vm1, %v1795_v24  ;;  %v1732_v29 = vmax.f32 %v1296_v25, 0.0  ;;  %v1796_v30 = vmax.f32 %v1552_v26, 0.0 }
 0x168   : > { %1861 = vst.msk [vmem:[%s2725_s18 + $0xc8] sm:$0xff] %vm1835_vm1, %v1732_v29  ;;  %1925 = vst.msk [vmem:[%s2725_s18 + $0x2c8] sm:$0xff] %vm1835_vm1, %v1796_v30 }
 0x169   : > { %v1300_v31 = vpop.f32.mrb[52].mxu0  ;;  %v1556_v32 = vpop.f32.mrb[52].mxu1 }
 0x16a   : > { %v1301_v33 = vadd.f32 %v2712_v57, %v1300_v31  ;;  %v1557_v34 = vadd.f32 %v2712_v57, %v1556_v32  ;;  %v1302_v35 = vpop.f32.mrb[53].mxu0  ;;  %v1558_v36 = vpop.f32.mrb[53].mxu1 }
 0x16b   : > { %v1303_v37 = vpop.f32.mrb[54].mxu0  ;;  %v1559_v38 = vpop.f32.mrb[54].mxu1 }
 0x16c   : > { %v1733_v39 = vmax.f32 %v1301_v33, 0.0  ;;  %v1797_v40 = vmax.f32 %v1557_v34, 0.0  ;;  %v1304_v41 = vadd.f32 %v2712_v57, %v1303_v37  ;;  %v1560_v42 = vadd.f32 %v2712_v57, %v1559_v38  ;;  %v1305_v43 = vpop.f32.mrb[55].mxu0  ;;  %v1561_v44 = vpop.f32.mrb[55].mxu1 }
 0x16e   : > { %1862 = vst.msk [vmem:[%s2725_s18 + $0xd0] sm:$0xff] %vm1835_vm1, %v1733_v39  ;;  %1926 = vst.msk [vmem:[%s2725_s18 + $0x2d0] sm:$0xff] %vm1835_vm1, %v1797_v40  ;;  %v1734_v45 = vmax.f32 %v1304_v41, 0.0  ;;  %v1798_v46 = vmax.f32 %v1560_v42, 0.0 }
 0x170   : > { %1863 = vst.msk [vmem:[%s2725_s18 + $0xd8] sm:$0xff] %vm1835_vm1, %v1734_v45  ;;  %1927 = vst.msk [vmem:[%s2725_s18 + $0x2d8] sm:$0xff] %vm1835_vm1, %v1798_v46 }
 0x171   : > { %v1308_v47 = vpop.f32.mrb[56].mxu0  ;;  %v1564_v48 = vpop.f32.mrb[56].mxu1 }
 0x172   : > { %v1309_v49 = vadd.f32 %v2712_v57, %v1308_v47  ;;  %v1565_v50 = vadd.f32 %v2712_v57, %v1564_v48  ;;  %v1310_v51 = vpop.f32.mrb[57].mxu0  ;;  %v1566_v52 = vpop.f32.mrb[57].mxu1 }
 0x173   : > { %v1311_v53 = vpop.f32.mrb[58].mxu0  ;;  %v1567_v54 = vpop.f32.mrb[58].mxu1 }
 0x174   : > { %v1735_v55 = vmax.f32 %v1309_v49, 0.0  ;;  %v1799_v56 = vmax.f32 %v1565_v50, 0.0  ;;  %v1312_v58 = vadd.f32 %v2712_v57, %v1311_v53  ;;  %v1568_v59 = vadd.f32 %v2712_v57, %v1567_v54  ;;  %v1313_v60 = vpop.f32.mrb[59].mxu0  ;;  %v1569_v61 = vpop.f32.mrb[59].mxu1 }
 0x176   : > { %1864 = vst.msk [vmem:[%s2725_s18 + $0xe0] sm:$0xff] %vm1835_vm1, %v1735_v55  ;;  %1928 = vst.msk [vmem:[%s2725_s18 + $0x2e0] sm:$0xff] %vm1835_vm1, %v1799_v56  ;;  %v1736_v62 = vmax.f32 %v1312_v58, 0.0  ;;  %v1800_v63 = vmax.f32 %v1568_v59, 0.0 }
 0x178   : > { %1865 = vst.msk [vmem:[%s2725_s18 + $0xe8] sm:$0xff] %vm1835_vm1, %v1736_v62  ;;  %1929 = vst.msk [vmem:[%s2725_s18 + $0x2e8] sm:$0xff] %vm1835_vm1, %v1800_v63 }
 0x179   : > { %v1316_v0 = vpop.f32.mrb[60].mxu0  ;;  %v1572_v1 = vpop.f32.mrb[60].mxu1 }
 0x17a   : > { %v1317_v2 = vadd.f32 %v2712_v57, %v1316_v0  ;;  %v1573_v3 = vadd.f32 %v2712_v57, %v1572_v1  ;;  %v1318_v4 = vpop.f32.mrb[61].mxu0  ;;  %v1574_v5 = vpop.f32.mrb[61].mxu1 }
 0x17b   : > { %v1319_v6 = vpop.f32.mrb[62].mxu0  ;;  %v1575_v7 = vpop.f32.mrb[62].mxu1 }
 0x17c   : > { %v1737_v8 = vmax.f32 %v1317_v2, 0.0  ;;  %v1801_v9 = vmax.f32 %v1573_v3, 0.0  ;;  %v1320_v10 = vadd.f32 %v2712_v57, %v1319_v6  ;;  %v1576_v11 = vadd.f32 %v2712_v57, %v1575_v7  ;;  %v1321_v12 = vpop.f32.mrb[63].mxu0  ;;  %v1577_v13 = vpop.f32.mrb[63].mxu1 }
 0x17e   : > { %1866 = vst.msk [vmem:[%s2725_s18 + $0xf0] sm:$0xff] %vm1835_vm1, %v1737_v8  ;;  %1930 = vst.msk [vmem:[%s2725_s18 + $0x2f0] sm:$0xff] %vm1835_vm1, %v1801_v9  ;;  %v1738_v14 = vmax.f32 %v1320_v10, 0.0  ;;  %v1802_v15 = vmax.f32 %v1576_v11, 0.0 }
 0x180   : > { %1867 = vst.msk [vmem:[%s2725_s18 + $0xf8] sm:$0xff] %vm1835_vm1, %v1738_v14  ;;  %1931 = vst.msk [vmem:[%s2725_s18 + $0x2f8] sm:$0xff] %vm1835_vm1, %v1802_v15 }
 0x181   : > { %v1324_v16 = vpop.f32.mrb[64].mxu0  ;;  %v1580_v17 = vpop.f32.mrb[64].mxu1 }
 0x182   : > { %v1325_v18 = vadd.f32 %v2712_v57, %v1324_v16  ;;  %v1581_v19 = vadd.f32 %v2712_v57, %v1580_v17  ;;  %v1326_v20 = vpop.f32.mrb[65].mxu0  ;;  %v1582_v21 = vpop.f32.mrb[65].mxu1 }
 0x183   : > { %v1327_v22 = vpop.f32.mrb[66].mxu0  ;;  %v1583_v23 = vpop.f32.mrb[66].mxu1 }
 0x184   : > { %v1739_v24 = vmax.f32 %v1325_v18, 0.0  ;;  %v1803_v25 = vmax.f32 %v1581_v19, 0.0  ;;  %v1328_v26 = vadd.f32 %v2712_v57, %v1327_v22  ;;  %v1584_v27 = vadd.f32 %v2712_v57, %v1583_v23  ;;  %v1329_v28 = vpop.f32.mrb[67].mxu0  ;;  %v1585_v29 = vpop.f32.mrb[67].mxu1 }
 0x186   : > { %1868 = vst.msk [vmem:[%s2725_s18 + $0x100] sm:$0xff] %vm1835_vm1, %v1739_v24  ;;  %1932 = vst.msk [vmem:[%s2725_s18 + $0x300] sm:$0xff] %vm1835_vm1, %v1803_v25  ;;  %v1740_v30 = vmax.f32 %v1328_v26, 0.0  ;;  %v1804_v31 = vmax.f32 %v1584_v27, 0.0 }
 0x188   : > { %1869 = vst.msk [vmem:[%s2725_s18 + $0x108] sm:$0xff] %vm1835_vm1, %v1740_v30  ;;  %1933 = vst.msk [vmem:[%s2725_s18 + $0x308] sm:$0xff] %vm1835_vm1, %v1804_v31 }
 0x189   : > { %v1332_v32 = vpop.f32.mrb[68].mxu0  ;;  %v1588_v33 = vpop.f32.mrb[68].mxu1 }
 0x18a   : > { %v1333_v34 = vadd.f32 %v2712_v57, %v1332_v32  ;;  %v1589_v35 = vadd.f32 %v2712_v57, %v1588_v33  ;;  %v1334_v36 = vpop.f32.mrb[69].mxu0  ;;  %v1590_v37 = vpop.f32.mrb[69].mxu1 }
 0x18b   : > { %v1335_v38 = vpop.f32.mrb[70].mxu0  ;;  %v1591_v39 = vpop.f32.mrb[70].mxu1 }
 0x18c   : > { %v1741_v40 = vmax.f32 %v1333_v34, 0.0  ;;  %v1805_v41 = vmax.f32 %v1589_v35, 0.0  ;;  %v1336_v42 = vadd.f32 %v2712_v57, %v1335_v38  ;;  %v1592_v43 = vadd.f32 %v2712_v57, %v1591_v39  ;;  %v1337_v44 = vpop.f32.mrb[71].mxu0  ;;  %v1593_v45 = vpop.f32.mrb[71].mxu1 }
 0x18e   : > { %1870 = vst.msk [vmem:[%s2725_s18 + $0x110] sm:$0xff] %vm1835_vm1, %v1741_v40  ;;  %1934 = vst.msk [vmem:[%s2725_s18 + $0x310] sm:$0xff] %vm1835_vm1, %v1805_v41  ;;  %v1742_v46 = vmax.f32 %v1336_v42, 0.0  ;;  %v1806_v47 = vmax.f32 %v1592_v43, 0.0 }
 0x190   : > { %1871 = vst.msk [vmem:[%s2725_s18 + $0x118] sm:$0xff] %vm1835_vm1, %v1742_v46  ;;  %1935 = vst.msk [vmem:[%s2725_s18 + $0x318] sm:$0xff] %vm1835_vm1, %v1806_v47 }
 0x191   : > { %v1340_v48 = vpop.f32.mrb[72].mxu0  ;;  %v1596_v49 = vpop.f32.mrb[72].mxu1 }
 0x192   : > { %v1341_v50 = vadd.f32 %v2712_v57, %v1340_v48  ;;  %v1597_v51 = vadd.f32 %v2712_v57, %v1596_v49  ;;  %v1342_v52 = vpop.f32.mrb[73].mxu0  ;;  %v1598_v53 = vpop.f32.mrb[73].mxu1 }
 0x193   : > { %v1343_v54 = vpop.f32.mrb[74].mxu0  ;;  %v1599_v55 = vpop.f32.mrb[74].mxu1 }
 0x194   : > { %v1743_v56 = vmax.f32 %v1341_v50, 0.0  ;;  %v1807_v58 = vmax.f32 %v1597_v51, 0.0  ;;  %v1344_v59 = vadd.f32 %v2712_v57, %v1343_v54  ;;  %v1600_v60 = vadd.f32 %v2712_v57, %v1599_v55  ;;  %v1345_v61 = vpop.f32.mrb[75].mxu0  ;;  %v1601_v62 = vpop.f32.mrb[75].mxu1 }
 0x196   : > { %1872 = vst.msk [vmem:[%s2725_s18 + $0x120] sm:$0xff] %vm1835_vm1, %v1743_v56  ;;  %1936 = vst.msk [vmem:[%s2725_s18 + $0x320] sm:$0xff] %vm1835_vm1, %v1807_v58  ;;  %v1744_v63 = vmax.f32 %v1344_v59, 0.0  ;;  %v1808_v0 = vmax.f32 %v1600_v60, 0.0 }
 0x198   : > { %1873 = vst.msk [vmem:[%s2725_s18 + $0x128] sm:$0xff] %vm1835_vm1, %v1744_v63  ;;  %1937 = vst.msk [vmem:[%s2725_s18 + $0x328] sm:$0xff] %vm1835_vm1, %v1808_v0 }
 0x199   : > { %v1348_v1 = vpop.f32.mrb[76].mxu0  ;;  %v1604_v2 = vpop.f32.mrb[76].mxu1 }
 0x19a   : > { %v1349_v3 = vadd.f32 %v2712_v57, %v1348_v1  ;;  %v1605_v4 = vadd.f32 %v2712_v57, %v1604_v2  ;;  %v1350_v5 = vpop.f32.mrb[77].mxu0  ;;  %v1606_v6 = vpop.f32.mrb[77].mxu1 }
 0x19b   : > { %v1351_v7 = vpop.f32.mrb[78].mxu0  ;;  %v1607_v8 = vpop.f32.mrb[78].mxu1 }
 0x19c   : > { %v1745_v9 = vmax.f32 %v1349_v3, 0.0  ;;  %v1809_v10 = vmax.f32 %v1605_v4, 0.0  ;;  %v1352_v11 = vadd.f32 %v2712_v57, %v1351_v7  ;;  %v1608_v12 = vadd.f32 %v2712_v57, %v1607_v8  ;;  %v1353_v13 = vpop.f32.mrb[79].mxu0  ;;  %v1609_v14 = vpop.f32.mrb[79].mxu1 }
 0x19d   : > { %v3031_v13 = vld [vmem:[%s3143_s2] ss:$0 sm:$0xff] }
 0x19e   : > { %1874 = vst.msk [vmem:[%s2725_s18 + $0x130] sm:$0xff] %vm1835_vm1, %v1745_v9  ;;  %1938 = vst.msk [vmem:[%s2725_s18 + $0x330] sm:$0xff] %vm1835_vm1, %v1809_v10  ;;  %v1746_v15 = vmax.f32 %v1352_v11, 0.0  ;;  %v1810_v16 = vmax.f32 %v1608_v12, 0.0 }
 0x1a0   : > { %1875 = vst.msk [vmem:[%s2725_s18 + $0x138] sm:$0xff] %vm1835_vm1, %v1746_v15  ;;  %1939 = vst.msk [vmem:[%s2725_s18 + $0x338] sm:$0xff] %vm1835_vm1, %v1810_v16 }
 0x1a1   : > { %v1356_v17 = vpop.f32.mrb[80].mxu0  ;;  %v1612_v18 = vpop.f32.mrb[80].mxu1 }
 0x1a2   : > { %v1357_v19 = vadd.f32 %v2712_v57, %v1356_v17  ;;  %v1613_v20 = vadd.f32 %v2712_v57, %v1612_v18  ;;  %v1358_v21 = vpop.f32.mrb[81].mxu0  ;;  %v1614_v22 = vpop.f32.mrb[81].mxu1 }
 0x1a3   : > { %v1359_v23 = vpop.f32.mrb[82].mxu0  ;;  %v1615_v24 = vpop.f32.mrb[82].mxu1 }
 0x1a4   : > { %v1747_v25 = vmax.f32 %v1357_v19, 0.0  ;;  %v1811_v26 = vmax.f32 %v1613_v20, 0.0  ;;  %v1360_v27 = vadd.f32 %v2712_v57, %v1359_v23  ;;  %v1616_v28 = vadd.f32 %v2712_v57, %v1615_v24  ;;  %v1361_v29 = vpop.f32.mrb[83].mxu0  ;;  %v1617_v30 = vpop.f32.mrb[83].mxu1 }
 0x1a6   : > { %1876 = vst.msk [vmem:[%s2725_s18 + $0x140] sm:$0xff] %vm1835_vm1, %v1747_v25  ;;  %1940 = vst.msk [vmem:[%s2725_s18 + $0x340] sm:$0xff] %vm1835_vm1, %v1811_v26  ;;  %v1748_v31 = vmax.f32 %v1360_v27, 0.0  ;;  %v1812_v32 = vmax.f32 %v1616_v28, 0.0 }
 0x1a8   : > { %1877 = vst.msk [vmem:[%s2725_s18 + $0x148] sm:$0xff] %vm1835_vm1, %v1748_v31  ;;  %1941 = vst.msk [vmem:[%s2725_s18 + $0x348] sm:$0xff] %vm1835_vm1, %v1812_v32 }
 0x1a9   : > { %v1364_v33 = vpop.f32.mrb[84].mxu0  ;;  %v1620_v34 = vpop.f32.mrb[84].mxu1 }
 0x1aa   : > { %v1365_v35 = vadd.f32 %v2712_v57, %v1364_v33  ;;  %v1621_v36 = vadd.f32 %v2712_v57, %v1620_v34  ;;  %v1366_v37 = vpop.f32.mrb[85].mxu0  ;;  %v1622_v38 = vpop.f32.mrb[85].mxu1 }
 0x1ab   : > { %v1367_v39 = vpop.f32.mrb[86].mxu0  ;;  %v1623_v40 = vpop.f32.mrb[86].mxu1 }
 0x1ac   : > { %v1749_v41 = vmax.f32 %v1365_v35, 0.0  ;;  %v1813_v42 = vmax.f32 %v1621_v36, 0.0  ;;  %v1368_v43 = vadd.f32 %v2712_v57, %v1367_v39  ;;  %v1624_v44 = vadd.f32 %v2712_v57, %v1623_v40  ;;  %v1369_v45 = vpop.f32.mrb[87].mxu0  ;;  %v1625_v46 = vpop.f32.mrb[87].mxu1 }
 0x1ae   : > { %1878 = vst.msk [vmem:[%s2725_s18 + $0x150] sm:$0xff] %vm1835_vm1, %v1749_v41  ;;  %1942 = vst.msk [vmem:[%s2725_s18 + $0x350] sm:$0xff] %vm1835_vm1, %v1813_v42  ;;  %v1750_v47 = vmax.f32 %v1368_v43, 0.0  ;;  %v1814_v48 = vmax.f32 %v1624_v44, 0.0 }
 0x1b0   : > { %1879 = vst.msk [vmem:[%s2725_s18 + $0x158] sm:$0xff] %vm1835_vm1, %v1750_v47  ;;  %1943 = vst.msk [vmem:[%s2725_s18 + $0x358] sm:$0xff] %vm1835_vm1, %v1814_v48 }
 0x1b1   : > { %v1372_v49 = vpop.f32.mrb[88].mxu0  ;;  %v1628_v50 = vpop.f32.mrb[88].mxu1 }
 0x1b2   : > { %v1373_v51 = vadd.f32 %v2712_v57, %v1372_v49  ;;  %v1629_v52 = vadd.f32 %v2712_v57, %v1628_v50  ;;  %v1374_v53 = vpop.f32.mrb[89].mxu0  ;;  %v1630_v54 = vpop.f32.mrb[89].mxu1 }
 0x1b3   : > { %v1375_v55 = vpop.f32.mrb[90].mxu0  ;;  %v1631_v56 = vpop.f32.mrb[90].mxu1 }
 0x1b4   : > { %v1751_v58 = vmax.f32 %v1373_v51, 0.0  ;;  %v1815_v59 = vmax.f32 %v1629_v52, 0.0  ;;  %v1376_v60 = vadd.f32 %v2712_v57, %v1375_v55  ;;  %v1632_v61 = vadd.f32 %v2712_v57, %v1631_v56  ;;  %v1377_v62 = vpop.f32.mrb[91].mxu0  ;;  %v1633_v63 = vpop.f32.mrb[91].mxu1 }
 0x1b6   : > { %1880 = vst.msk [vmem:[%s2725_s18 + $0x160] sm:$0xff] %vm1835_vm1, %v1751_v58  ;;  %1944 = vst.msk [vmem:[%s2725_s18 + $0x360] sm:$0xff] %vm1835_vm1, %v1815_v59  ;;  %v1752_v0 = vmax.f32 %v1376_v60, 0.0  ;;  %v1816_v1 = vmax.f32 %v1632_v61, 0.0 }
 0x1b8   : > { %1881 = vst.msk [vmem:[%s2725_s18 + $0x168] sm:$0xff] %vm1835_vm1, %v1752_v0  ;;  %1945 = vst.msk [vmem:[%s2725_s18 + $0x368] sm:$0xff] %vm1835_vm1, %v1816_v1 }
 0x1b9   : > { %v1380_v2 = vpop.f32.mrb[92].mxu0  ;;  %v1636_v3 = vpop.f32.mrb[92].mxu1 }
 0x1ba   : > { %v1381_v4 = vadd.f32 %v2712_v57, %v1380_v2  ;;  %v1637_v5 = vadd.f32 %v2712_v57, %v1636_v3  ;;  %v1382_v6 = vpop.f32.mrb[93].mxu0  ;;  %v1638_v7 = vpop.f32.mrb[93].mxu1 }
 0x1bb   : > { %v1383_v8 = vpop.f32.mrb[94].mxu0  ;;  %v1639_v9 = vpop.f32.mrb[94].mxu1 }
 0x1bc   : > { %v1753_v10 = vmax.f32 %v1381_v4, 0.0  ;;  %v1817_v11 = vmax.f32 %v1637_v5, 0.0  ;;  %v1384_v12 = vadd.f32 %v2712_v57, %v1383_v8  ;;  %v1640_v14 = vadd.f32 %v3031_v13, %v1639_v9  ;;  %v1385_v15 = vpop.f32.mrb[95].mxu0  ;;  %v1641_v16 = vpop.f32.mrb[95].mxu1 }
 0x1be   : > { %1882 = vst.msk [vmem:[%s2725_s18 + $0x170] sm:$0xff] %vm1835_vm1, %v1753_v10  ;;  %1946 = vst.msk [vmem:[%s2725_s18 + $0x370] sm:$0xff] %vm1835_vm1, %v1817_v11  ;;  %v1754_v17 = vmax.f32 %v1384_v12, 0.0  ;;  %v1818_v18 = vmax.f32 %v1640_v14, 0.0 }
 0x1c0   : > { %1883 = vst.msk [vmem:[%s2725_s18 + $0x178] sm:$0xff] %vm1835_vm1, %v1754_v17  ;;  %1947 = vst.msk [vmem:[%s2725_s18 + $0x378] sm:$0xff] %vm1835_vm1, %v1818_v18 }
 0x1c1   : > { %v1388_v57 = vpop.f32.mrb[96].mxu0  ;;  %v1644_v19 = vpop.f32.mrb[96].mxu1 }
 0x1c2   : > { %v1389_v20 = vadd.f32 %v3031_v13, %v1388_v57  ;;  %v1645_v21 = vadd.f32 %v3031_v13, %v1644_v19  ;;  %v1390_v22 = vpop.f32.mrb[97].mxu0  ;;  %v1646_v23 = vpop.f32.mrb[97].mxu1 }
 0x1c3   : > { %v1391_v24 = vpop.f32.mrb[98].mxu0  ;;  %v1647_v25 = vpop.f32.mrb[98].mxu1 }
 0x1c4   : > { %v1755_v26 = vmax.f32 %v1389_v20, 0.0  ;;  %v1819_v27 = vmax.f32 %v1645_v21, 0.0  ;;  %v1392_v28 = vadd.f32 %v3031_v13, %v1391_v24  ;;  %v1648_v29 = vadd.f32 %v3031_v13, %v1647_v25  ;;  %v1393_v30 = vpop.f32.mrb[99].mxu0  ;;  %v1649_v31 = vpop.f32.mrb[99].mxu1 }
 0x1c6   : > { %1884 = vst.msk [vmem:[%s2725_s18 + $0x180] sm:$0xff] %vm1835_vm1, %v1755_v26  ;;  %1948 = vst.msk [vmem:[%s2725_s18 + $0x380] sm:$0xff] %vm1835_vm1, %v1819_v27  ;;  %v1756_v32 = vmax.f32 %v1392_v28, 0.0  ;;  %v1820_v33 = vmax.f32 %v1648_v29, 0.0 }
 0x1c8   : > { %1885 = vst.msk [vmem:[%s2725_s18 + $0x188] sm:$0xff] %vm1835_vm1, %v1756_v32  ;;  %1949 = vst.msk [vmem:[%s2725_s18 + $0x388] sm:$0xff] %vm1835_vm1, %v1820_v33 }
 0x1c9   : > { %v1396_v34 = vpop.f32.mrb[100].mxu0  ;;  %v1652_v35 = vpop.f32.mrb[100].mxu1 }
 0x1ca   : > { %v1397_v36 = vadd.f32 %v3031_v13, %v1396_v34  ;;  %v1653_v37 = vadd.f32 %v3031_v13, %v1652_v35  ;;  %v1398_v38 = vpop.f32.mrb[101].mxu0  ;;  %v1654_v39 = vpop.f32.mrb[101].mxu1 }
 0x1cb   : > { %v1399_v40 = vpop.f32.mrb[102].mxu0  ;;  %v1655_v41 = vpop.f32.mrb[102].mxu1 }
 0x1cc   : > { %v1757_v42 = vmax.f32 %v1397_v36, 0.0  ;;  %v1821_v43 = vmax.f32 %v1653_v37, 0.0  ;;  %v1400_v44 = vadd.f32 %v3031_v13, %v1399_v40  ;;  %v1656_v45 = vadd.f32 %v3031_v13, %v1655_v41  ;;  %v1401_v46 = vpop.f32.mrb[103].mxu0  ;;  %v1657_v47 = vpop.f32.mrb[103].mxu1 }
 0x1ce   : > { %1886 = vst.msk [vmem:[%s2725_s18 + $0x190] sm:$0xff] %vm1835_vm1, %v1757_v42  ;;  %1950 = vst.msk [vmem:[%s2725_s18 + $0x390] sm:$0xff] %vm1835_vm1, %v1821_v43  ;;  %v1758_v48 = vmax.f32 %v1400_v44, 0.0  ;;  %v1822_v49 = vmax.f32 %v1656_v45, 0.0 }
 0x1d0   : > { %1887 = vst.msk [vmem:[%s2725_s18 + $0x198] sm:$0xff] %vm1835_vm1, %v1758_v48  ;;  %1951 = vst.msk [vmem:[%s2725_s18 + $0x398] sm:$0xff] %vm1835_vm1, %v1822_v49 }
 0x1d1   : > { %v1404_v50 = vpop.f32.mrb[104].mxu0  ;;  %v1660_v51 = vpop.f32.mrb[104].mxu1 }
 0x1d2   : > { %v1405_v52 = vadd.f32 %v3031_v13, %v1404_v50  ;;  %v1661_v53 = vadd.f32 %v3031_v13, %v1660_v51  ;;  %v1406_v54 = vpop.f32.mrb[105].mxu0  ;;  %v1662_v55 = vpop.f32.mrb[105].mxu1 }
 0x1d3   : > { %v1407_v56 = vpop.f32.mrb[106].mxu0  ;;  %v1663_v58 = vpop.f32.mrb[106].mxu1 }
 0x1d4   : > { %v1759_v59 = vmax.f32 %v1405_v52, 0.0  ;;  %v1823_v60 = vmax.f32 %v1661_v53, 0.0  ;;  %v1408_v61 = vadd.f32 %v3031_v13, %v1407_v56  ;;  %v1664_v62 = vadd.f32 %v3031_v13, %v1663_v58  ;;  %v1409_v63 = vpop.f32.mrb[107].mxu0  ;;  %v1665_v0 = vpop.f32.mrb[107].mxu1 }
 0x1d6   : > { %1888 = vst.msk [vmem:[%s2725_s18 + $0x1a0] sm:$0xff] %vm1835_vm1, %v1759_v59  ;;  %1952 = vst.msk [vmem:[%s2725_s18 + $0x3a0] sm:$0xff] %vm1835_vm1, %v1823_v60  ;;  %v1760_v1 = vmax.f32 %v1408_v61, 0.0  ;;  %v1824_v2 = vmax.f32 %v1664_v62, 0.0 }
 0x1d8   : > { %1889 = vst.msk [vmem:[%s2725_s18 + $0x1a8] sm:$0xff] %vm1835_vm1, %v1760_v1  ;;  %1953 = vst.msk [vmem:[%s2725_s18 + $0x3a8] sm:$0xff] %vm1835_vm1, %v1824_v2 }
 0x1d9   : > { %v1412_v3 = vpop.f32.mrb[108].mxu0  ;;  %v1668_v4 = vpop.f32.mrb[108].mxu1 }
 0x1da   : > { %v1413_v5 = vadd.f32 %v3031_v13, %v1412_v3  ;;  %v1669_v6 = vadd.f32 %v3031_v13, %v1668_v4  ;;  %v1414_v7 = vpop.f32.mrb[109].mxu0  ;;  %v1670_v8 = vpop.f32.mrb[109].mxu1 }
 0x1db   : > { %v1415_v9 = vpop.f32.mrb[110].mxu0  ;;  %v1671_v10 = vpop.f32.mrb[110].mxu1 }
 0x1dc   : > { %v1761_v11 = vmax.f32 %v1413_v5, 0.0  ;;  %v1825_v12 = vmax.f32 %v1669_v6, 0.0  ;;  %v1416_v14 = vadd.f32 %v3031_v13, %v1415_v9  ;;  %v1672_v15 = vadd.f32 %v3031_v13, %v1671_v10  ;;  %v1417_v16 = vpop.f32.mrb[111].mxu0  ;;  %v1673_v17 = vpop.f32.mrb[111].mxu1 }
 0x1de   : > { %1890 = vst.msk [vmem:[%s2725_s18 + $0x1b0] sm:$0xff] %vm1835_vm1, %v1761_v11  ;;  %1954 = vst.msk [vmem:[%s2725_s18 + $0x3b0] sm:$0xff] %vm1835_vm1, %v1825_v12  ;;  %v1762_v18 = vmax.f32 %v1416_v14, 0.0  ;;  %v1826_v57 = vmax.f32 %v1672_v15, 0.0 }
 0x1e0   : > { %1891 = vst.msk [vmem:[%s2725_s18 + $0x1b8] sm:$0xff] %vm1835_vm1, %v1762_v18  ;;  %1955 = vst.msk [vmem:[%s2725_s18 + $0x3b8] sm:$0xff] %vm1835_vm1, %v1826_v57 }
 0x1e1   : > { %v1420_v19 = vpop.f32.mrb[112].mxu0  ;;  %v1676_v20 = vpop.f32.mrb[112].mxu1 }
 0x1e2   : > { %v1421_v21 = vadd.f32 %v3031_v13, %v1420_v19  ;;  %v1677_v22 = vadd.f32 %v3031_v13, %v1676_v20  ;;  %v1422_v23 = vpop.f32.mrb[113].mxu0  ;;  %v1678_v24 = vpop.f32.mrb[113].mxu1 }
 0x1e3   : > { %v1423_v25 = vpop.f32.mrb[114].mxu0  ;;  %v1679_v26 = vpop.f32.mrb[114].mxu1 }
 0x1e4   : > { %v1763_v27 = vmax.f32 %v1421_v21, 0.0  ;;  %v1827_v28 = vmax.f32 %v1677_v22, 0.0  ;;  %v1424_v29 = vadd.f32 %v3031_v13, %v1423_v25  ;;  %v1680_v30 = vadd.f32 %v3031_v13, %v1679_v26  ;;  %v1425_v31 = vpop.f32.mrb[115].mxu0  ;;  %v1681_v32 = vpop.f32.mrb[115].mxu1 }
 0x1e6   : > { %1892 = vst.msk [vmem:[%s2725_s18 + $0x1c0] sm:$0xff] %vm1835_vm1, %v1763_v27  ;;  %1956 = vst.msk [vmem:[%s2725_s18 + $0x3c0] sm:$0xff] %vm1835_vm1, %v1827_v28  ;;  %v1764_v33 = vmax.f32 %v1424_v29, 0.0  ;;  %v1828_v34 = vmax.f32 %v1680_v30, 0.0 }
 0x1e8   : > { %1893 = vst.msk [vmem:[%s2725_s18 + $0x1c8] sm:$0xff] %vm1835_vm1, %v1764_v33  ;;  %1957 = vst.msk [vmem:[%s2725_s18 + $0x3c8] sm:$0xff] %vm1835_vm1, %v1828_v34 }
 0x1e9   : > { %v1428_v35 = vpop.f32.mrb[116].mxu0  ;;  %v1684_v36 = vpop.f32.mrb[116].mxu1 }
 0x1ea   : > { %v1429_v37 = vadd.f32 %v3031_v13, %v1428_v35  ;;  %v1685_v38 = vadd.f32 %v3031_v13, %v1684_v36  ;;  %v1430_v39 = vpop.f32.mrb[117].mxu0  ;;  %v1686_v40 = vpop.f32.mrb[117].mxu1 }
 0x1eb   : > { %v1431_v41 = vpop.f32.mrb[118].mxu0  ;;  %v1687_v42 = vpop.f32.mrb[118].mxu1 }
 0x1ec   : > { %v1765_v43 = vmax.f32 %v1429_v37, 0.0  ;;  %v1829_v44 = vmax.f32 %v1685_v38, 0.0  ;;  %v1432_v45 = vadd.f32 %v3031_v13, %v1431_v41  ;;  %v1688_v46 = vadd.f32 %v3031_v13, %v1687_v42  ;;  %v1433_v47 = vpop.f32.mrb[119].mxu0  ;;  %v1689_v48 = vpop.f32.mrb[119].mxu1 }
 0x1ee   : > { %1894 = vst.msk [vmem:[%s2725_s18 + $0x1d0] sm:$0xff] %vm1835_vm1, %v1765_v43  ;;  %1958 = vst.msk [vmem:[%s2725_s18 + $0x3d0] sm:$0xff] %vm1835_vm1, %v1829_v44  ;;  %v1766_v49 = vmax.f32 %v1432_v45, 0.0  ;;  %v1830_v50 = vmax.f32 %v1688_v46, 0.0 }
 0x1f0   : > { %1895 = vst.msk [vmem:[%s2725_s18 + $0x1d8] sm:$0xff] %vm1835_vm1, %v1766_v49  ;;  %1959 = vst.msk [vmem:[%s2725_s18 + $0x3d8] sm:$0xff] %vm1835_vm1, %v1830_v50 }
 0x1f1   : > { %v1436_v51 = vpop.f32.mrb[120].mxu0  ;;  %v1692_v52 = vpop.f32.mrb[120].mxu1 }
 0x1f2   : > { %v1437_v53 = vadd.f32 %v3031_v13, %v1436_v51  ;;  %v1693_v54 = vadd.f32 %v3031_v13, %v1692_v52  ;;  %v1438_v55 = vpop.f32.mrb[121].mxu0  ;;  %v1694_v56 = vpop.f32.mrb[121].mxu1 }
 0x1f3   : > { %v1439_v58 = vpop.f32.mrb[122].mxu0  ;;  %v1695_v59 = vpop.f32.mrb[122].mxu1 }
 0x1f4   : > { %v1767_v60 = vmax.f32 %v1437_v53, 0.0  ;;  %v1831_v61 = vmax.f32 %v1693_v54, 0.0  ;;  %v1440_v62 = vadd.f32 %v3031_v13, %v1439_v58  ;;  %v1696_v63 = vadd.f32 %v3031_v13, %v1695_v59  ;;  %v1441_v0 = vpop.f32.mrb[123].mxu0  ;;  %v1697_v1 = vpop.f32.mrb[123].mxu1 }
 0x1f6   : > { %1896 = vst.msk [vmem:[%s2725_s18 + $0x1e0] sm:$0xff] %vm1835_vm1, %v1767_v60  ;;  %1960 = vst.msk [vmem:[%s2725_s18 + $0x3e0] sm:$0xff] %vm1835_vm1, %v1831_v61  ;;  %v1768_v2 = vmax.f32 %v1440_v62, 0.0  ;;  %v1832_v3 = vmax.f32 %v1696_v63, 0.0 }
 0x1f8   : > { %1897 = vst.msk [vmem:[%s2725_s18 + $0x1e8] sm:$0xff] %vm1835_vm1, %v1768_v2  ;;  %1961 = vst.msk [vmem:[%s2725_s18 + $0x3e8] sm:$0xff] %vm1835_vm1, %v1832_v3 }
 0x1f9   : > { %v1444_v4 = vpop.f32.mrb[124].mxu0  ;;  %v1700_v5 = vpop.f32.mrb[124].mxu1 }
 0x1fa   : > { %v1445_v6 = vadd.f32 %v3031_v13, %v1444_v4  ;;  %v1701_v7 = vadd.f32 %v3031_v13, %v1700_v5  ;;  %v1446_v8 = vpop.f32.mrb[125].mxu0  ;;  %v1702_v9 = vpop.f32.mrb[125].mxu1 }
 0x1fb   : > { %v1447_v10 = vpop.f32.mrb[126].mxu0  ;;  %v1703_v11 = vpop.f32.mrb[126].mxu1 }
 0x1fc   : > { %v1769_v12 = vmax.f32 %v1445_v6, 0.0  ;;  %v1833_v14 = vmax.f32 %v1701_v7, 0.0  ;;  %v1448_v15 = vadd.f32 %v3031_v13, %v1447_v10  ;;  %v1704_v16 = vadd.f32 %v3031_v13, %v1703_v11  ;;  %v1449_v17 = vpop.f32.mrb[127].mxu0  ;;  %v1705_v18 = vpop.f32.mrb[127].mxu1 }
 0x1fe   : > { %1898 = vst.msk [vmem:[%s2725_s18 + $0x1f0] sm:$0xff] %vm1835_vm1, %v1769_v12  ;;  %1962 = vst.msk [vmem:[%s2725_s18 + $0x3f0] sm:$0xff] %vm1835_vm1, %v1833_v14  ;;  %v1770_v57 = vmax.f32 %v1448_v15, 0.0  ;;  %v1834_v19 = vmax.f32 %v1704_v16, 0.0 }
 0x200   : > { %1899 = vst.msk [vmem:[%s2725_s18 + $0x1f8] sm:$0xff] %vm1835_vm1, %v1770_v57  ;;  %1963 = vst.msk [vmem:[%s2725_s18 + $0x3f8] sm:$0xff] %vm1835_vm1, %v1834_v19 }
 0x201 PF: > { %s13_s12 = sadd.s32 1, %s2474_s12  }
 0x202   : > { %p10_p4 = scmp.ge.s32.totalorder %s13_s12, 4  }
 0x204   :  { %12 = sbr.rel (!%p10_p4) target bundleno = 1 (0x1), region = 62 }

</bundles_post_ra>
